<compile_context>
chip_gen: v7x
topology: tpu7x:2x2x1
jax: 0.10.0
libtpu: 0.0.40
codegen_flags: <defaults>
</compile_context>

<pallas_src>
import jax
import jax.numpy as jnp
from jax import lax
from jax.experimental import pallas as pl
from jax.experimental.pallas import tpu as pltpu

LANE = 128       # TPU lane width: contraction / channel axes padded to this
SUBLANE = 8      # sublane granularity: flat row stride aligned to this
_MASK_BIG = 1e9  # routed through the indicator lanes; ReLU clamps masked positions to 0


def _round_up(v, m):
    return (v + m - 1) // m * m


def _pick_band_height(H):
    for bh in (8, 16, 32, 4, 2):
        if H % bh == 0:
            return bh
    return H


def basic_encode_block_pallas(x_nchw, params):
    """Fused BasicEncodeBlock forward. x_nchw: (N, Cin, H, W) float32. Returns NCHW."""
    N, Cin, H, W = x_nchw.shape
    Cout = params["w1"].shape[-1]
    f32 = jnp.float32

    Hp, Wp = H + 2, W + 2                       # zero-padded spatial dims (pad=1 for 3x3)
    Wrs = _round_up(Wp, SUBLANE)                # sublane-aligned flat row stride
    BH = _pick_band_height(H)                   # output image-rows per band
    NB = H // BH
    ZROWS = (BH + 2) * Wrs                      # band rows incl. 1-row halo top/bottom
    OUTR = BH * Wrs                             # output flat rows per band

    K1 = 15 * Cin + 3                           # 3x5 im2col taps + 3 padding-indicator lanes
    KP1 = _round_up(K1, LANE)
    KZ = _round_up(3 * Cout + Cin, LANE)        # kx-folded y1 groups + raw-x passthrough
    Cpad = _round_up(Cout, LANE)
    CONV_LANES = 3 * Cout                       # z lanes < CONV_LANES: ReLU'd y1 copies

    # ---------------- wrapper glue: im2col + weight packing (pure layout work) ----------
    x = jnp.transpose(x_nchw, (0, 2, 3, 1)).astype(f32)                          # NHWC
    xpad = jnp.pad(x, ((0, 0), (1, 1), (1, 1 + Wrs - Wp), (0, 0)))               # (N,Hp,Wrs,Cin)
    xp3 = jnp.pad(xpad, ((0, 0), (1, 1), (2, 2), (0, 0)))                        # +1 row, +2 col

    taps = []
    for dr in (-1, 0, 1):
        for dc in (-2, -1, 0, 1, 2):
            taps.append(xp3[:, 1 + dr:1 + dr + Hp, 2 + dc:2 + dc + Wrs, :])
    x_cols = jnp.concatenate(taps, axis=-1)                                      # (N,Hp,Wrs,15*Cin)

    # indicator lanes: 1.0 where y1 at column offset (kx-1) is a conv2 zero-padding
    # position (outside the HxW interior); weighted by -1e9 in W1p so ReLU yields 0.
    rr = jnp.arange(Hp)[:, None]
    cc = jnp.arange(Wrs)[None, :]
    row_bad = jnp.logical_or(rr < 1, rr > H)
    inds = []
    for kx in range(3):
        cs = cc + (kx - 1)
        col_bad = jnp.logical_or(cs < 1, cs > W)
        inds.append(jnp.logical_or(row_bad, col_bad).astype(f32))
    ind = jnp.broadcast_to(jnp.stack(inds, axis=-1)[None], (N, Hp, Wrs, 3))

    x_cols = jnp.concatenate([x_cols, ind], axis=-1)                             # (N,Hp,Wrs,K1)
    x_cols = jnp.pad(x_cols, ((0, 0), (0, 0), (0, 0), (0, KP1 - K1)))
    # band the rows; the 1-row halo is duplicated so every (n, band) step is independent
    x_cols_b = jnp.stack(
        [x_cols[:, b * BH:b * BH + BH + 2].reshape(N, ZROWS, KP1) for b in range(NB)],
        axis=1)                                                                  # (N,NB,ZROWS,KP1)

    w1 = params["w1"].astype(f32)                # (3,3,Cin,Cout) HWIO
    w2 = params["w2"].astype(f32)
    wsc = params["wsc"].astype(f32).reshape(Cin, Cout)

    # W1p: x_cols lanes -> z lanes; z = [y1(col-1) | y1(col) | y1(col+1) | x_center].
    W1p = jnp.zeros((KP1, KZ), f32)
    for kx in range(3):                          # z lane group = y1 at column offset kx-1
        for kyp in range(3):
            for kxp in range(3):
                t = kyp * 5 + ((kx - 1) + (kxp - 1) + 2)
                W1p = W1p.at[t * Cin:(t + 1) * Cin,
                             kx * Cout:(kx + 1) * Cout].set(w1[kyp, kxp])
        W1p = W1p.at[15 * Cin + kx, kx * Cout:(kx + 1) * Cout].set(-_MASK_BIG)
    # raw-x passthrough (center tap index 7) feeding the 1x1 shortcut
    W1p = W1p.at[7 * Cin:8 * Cin, CONV_LANES:CONV_LANES + Cin].set(jnp.eye(Cin, dtype=f32))

    b1p = jnp.zeros((1, KZ), f32).at[0, :CONV_LANES].set(jnp.tile(params["b1"].astype(f32), 3))

    # W2p[ky]: z lanes -> output channels; shortcut weight rides on the ky=1 passthrough.
    W2p = jnp.zeros((3, KZ, Cpad), f32)
    for ky in range(3):
        for kx in range(3):
            W2p = W2p.at[ky, kx * Cout:(kx + 1) * Cout, :Cout].set(w2[ky, kx])
    W2p = W2p.at[1, CONV_LANES:CONV_LANES + Cin, :Cout].set(wsc)

    boutp = jnp.zeros((1, Cpad), f32).at[0, :Cout].set(
        params["b2"].astype(f32) + params["bsc"].astype(f32))

    # ---------------- the fused kernel: one (image, row-band) per grid step -------------
    def kernel(xcols_ref, w1_ref, b1_ref, w2_ref, bout_ref, out_ref, z_ref):
        # conv1 with all 9 taps (and padding masks) in the contraction: ONE lane-dense dot.
        t = jnp.dot(xcols_ref[...], w1_ref[...],
                    preferred_element_type=jnp.float32) + b1_ref[...]
        lane = lax.broadcasted_iota(jnp.int32, (ZROWS, KZ), 1)
        # ReLU the y1 copies (masked positions are <= -1e9 -> exactly 0); keep raw x lanes.
        z_ref[...] = jnp.where(lane < CONV_LANES, jnp.maximum(t, 0.0), t)

        # conv2 (kx folded into lanes) + 1x1 shortcut: 3 ky taps, each a sublane-aligned
        # full-lane-width slab read and one MXU dot.
        acc = jnp.zeros((OUTR, Cpad), jnp.float32)
        for ky in range(3):
            acc = acc + jnp.dot(z_ref[pl.ds(ky * Wrs, OUTR), :], w2_ref[ky],
                                preferred_element_type=jnp.float32)
        out_ref[...] = jnp.maximum(acc + bout_ref[...], 0.0).astype(out_ref.dtype)

    # VMEM budget from the actual block sizes (x_cols / out double-buffered, constants
    # counted double-buffered as the worst case, plus the z scratch); clamp for v7x.
    const_bytes = 4 * (KP1 * KZ + KZ + 3 * KZ * Cpad + Cpad)
    block_bytes = 4 * (2 * ZROWS * KP1 + 2 * OUTR * Cpad + ZROWS * KZ) + 2 * const_bytes
    vmem_limit = int(min(48 * 2**20, max(32 * 2**20, 2 * block_bytes)))

    out_struct = jax.ShapeDtypeStruct((N, NB, OUTR, Cpad), f32)

    def run(single_buffer_consts):
        ck = dict(pipeline_mode=pl.Buffered(1)) if single_buffer_consts else {}
        in_specs = [
            pl.BlockSpec((None, None, ZROWS, KP1), lambda n, b: (n, b, 0, 0)),
            pl.BlockSpec((KP1, KZ), lambda n, b: (0, 0), **ck),
            pl.BlockSpec((1, KZ), lambda n, b: (0, 0), **ck),
            pl.BlockSpec((3, KZ, Cpad), lambda n, b: (0, 0, 0), **ck),
            pl.BlockSpec((1, Cpad), lambda n, b: (0, 0), **ck),
        ]
        return pl.pallas_call(
            kernel,
            out_shape=out_struct,
            grid=(N, NB),
            in_specs=in_specs,
            out_specs=pl.BlockSpec((None, None, OUTR, Cpad), lambda n, b: (n, b, 0, 0)),
            scratch_shapes=[pltpu.VMEM((ZROWS, KZ), f32)],
            compiler_params=pltpu.CompilerParams(
                dimension_semantics=("parallel", "parallel"),   # independent steps -> megacore
                vmem_limit_bytes=vmem_limit,
            ),
        )(x_cols_b, W1p, b1p, W2p, boutp)

    try:
        out_raw = run(True)
    except Exception:
        # pl.Buffered(1) not accepted by this JAX build -> default double buffering.
        out_raw = run(False)

    # ---- glue: drop padding columns / padded channels, return NCHW ----
    out = out_raw.reshape(N, H, Wrs, Cpad)[:, :, 1:W + 1, :Cout]
    return jnp.transpose(out, (0, 3, 1, 2))


def reference_forward(x_nchw, params):
    """Pure-JAX reference (mirrors the PyTorch forward for this config)."""
    x = jnp.transpose(x_nchw, (0, 2, 3, 1)).astype(jnp.float32)  # NHWC
    dn = ("NHWC", "HWIO", "NHWC")
    y1 = lax.conv_general_dilated(x, params["w1"], (1, 1), "SAME",
                                  dimension_numbers=dn) + params["b1"]
    y1 = jnp.maximum(y1, 0.0)
    y2 = lax.conv_general_dilated(y1, params["w2"], (1, 1), "SAME",
                                  dimension_numbers=dn) + params["b2"]
    sc = lax.conv_general_dilated(x, params["wsc"], (1, 1), "SAME",
                                  dimension_numbers=dn) + params["bsc"]
    out = jnp.maximum(y2 + sc, 0.0)
    return jnp.transpose(out, (0, 3, 1, 2))


def make_params(key, cin, cout):
    k1, k2, k3, k4, k5, k6 = jax.random.split(key, 6)
    s1 = (2.0 / (9 * cin)) ** 0.5
    s2 = (2.0 / (9 * cout)) ** 0.5
    s3 = (2.0 / cin) ** 0.5
    return {
        "w1": jax.random.normal(k1, (3, 3, cin, cout), jnp.float32) * s1,
        "b1": jax.random.normal(k2, (cout,), jnp.float32) * 0.01,
        "w2": jax.random.normal(k3, (3, 3, cout, cout), jnp.float32) * s2,
        "b2": jax.random.normal(k4, (cout,), jnp.float32) * 0.01,
        "wsc": jax.random.normal(k5, (1, 1, cin, cout), jnp.float32) * s3,
        "bsc": jax.random.normal(k6, (cout,), jnp.float32) * 0.01,
    }


if __name__ == "__main__":
    key = jax.random.PRNGKey(0)
    k_in, k_par = jax.random.split(key)

    N, Cin, H, W = 2, 4, 16, 16
    Cout = 8
    x = jax.random.normal(k_in, (N, Cin, H, W), jnp.float32)   # NCHW, like PyTorch
    params = make_params(k_par, Cin, Cout)

    out = jax.block_until_ready(basic_encode_block_pallas(x, params))
    ref = jax.block_until_ready(reference_forward(x, params))

    err = float(jnp.max(jnp.abs(out - ref)))
    assert out.shape == (N, Cout, H, W), out.shape
    assert err < 1e-3, f"max abs error {err}"

    print("KERNEL_OK")
</pallas_src>

<mosaic_0001>
module attributes {stable_mosaic.version = 11 : i64} {
  func.func @kernel(%arg0: i32, %arg1: i32, %arg2: memref<1x1x240x128xf32, #tpu.memory_space<vmem>>, %arg3: memref<128x128xf32, #tpu.memory_space<vmem>>, %arg4: memref<1x128xf32, #tpu.memory_space<vmem>>, %arg5: memref<3x128x128xf32, #tpu.memory_space<vmem>>, %arg6: memref<1x128xf32, #tpu.memory_space<vmem>>, %arg7: memref<1x1x192x128xf32, #tpu.memory_space<vmem>>, %arg8: memref<240x128xf32, #tpu.memory_space<vmem>>) attributes {dimension_semantics = [#tpu.dimension_semantics<parallel>, #tpu.dimension_semantics<parallel>], iteration_bounds = array<i64: 2, 2>, scalar_prefetch = 0 : i64, scratch_operands = 1 : i64, tpu.core_type = #tpu.core_type<tc>, window_params = [{transform_indices = @transform_0, window_bounds = array<i64: 1, 1, 240, 128>}, {pipeline_mode = #tpu.pipeline_mode<synchronous>, transform_indices = @transform_1, window_bounds = array<i64: 128, 128>}, {pipeline_mode = #tpu.pipeline_mode<synchronous>, transform_indices = @transform_2, window_bounds = array<i64: 1, 128>}, {pipeline_mode = #tpu.pipeline_mode<synchronous>, transform_indices = @transform_3, window_bounds = array<i64: 3, 128, 128>}, {pipeline_mode = #tpu.pipeline_mode<synchronous>, transform_indices = @transform_4, window_bounds = array<i64: 1, 128>}, {transform_indices = @transform_5, window_bounds = array<i64: 1, 1, 192, 128>}]} {
    %c0 = arith.constant 0 : index
    %c0_0 = arith.constant 0 : index
    %c0_1 = arith.constant 0 : index
    %c0_2 = arith.constant 0 : index
    %0 = vector.load %arg2[%c0, %c0_0, %c0_1, %c0_2] : memref<1x1x240x128xf32, #tpu.memory_space<vmem>>, vector<1x1x240x128xf32>
    %1 = vector.shape_cast %0 : vector<1x1x240x128xf32> to vector<240x128xf32>
    %c0_3 = arith.constant 0 : index
    %c0_4 = arith.constant 0 : index
    %2 = vector.load %arg3[%c0_3, %c0_4] : memref<128x128xf32, #tpu.memory_space<vmem>>, vector<128x128xf32>
    %cst = arith.constant dense<0.000000e+00> : vector<240x128xf32>
    %3 = tpu.matmul %1, %2, %cst {dimension_numbers = #tpu.dot_dimension_numbers<[1], [0], [0], [1], [0, 0, 1, 1], [], []>} : vector<240x128xf32>, vector<128x128xf32>, vector<240x128xf32> -> vector<240x128xf32>
    %c0_5 = arith.constant 0 : index
    %c0_6 = arith.constant 0 : index
    %4 = vector.load %arg4[%c0_5, %c0_6] : memref<1x128xf32, #tpu.memory_space<vmem>>, vector<1x128xf32>
    %5 = vector.broadcast %4 : vector<1x128xf32> to vector<240x128xf32>
    %6 = arith.addf %3, %5 : vector<240x128xf32>
    %7 = tpu.iota {dimensions = array<i32: 1>} : vector<240x128xi32>
    %c24_i32 = arith.constant 24 : i32
    %8 = vector.broadcast %c24_i32 : i32 to vector<240x128xi32>
    %9 = arith.cmpi slt, %7, %8 : vector<240x128xi32>
    %cst_7 = arith.constant 0.000000e+00 : f32
    %10 = vector.broadcast %cst_7 : f32 to vector<240x128xf32>
    %11 = arith.maximumf %6, %10 : vector<240x128xf32>
    %12 = arith.select %9, %11, %6 : vector<240x128xi1>, vector<240x128xf32>
    %c0_8 = arith.constant 0 : index
    %c0_9 = arith.constant 0 : index
    %13 = vector.load %arg8[%c0_8, %c0_9] : memref<240x128xf32, #tpu.memory_space<vmem>>, vector<240x128xf32>
    tpu.vector_store %arg8[%c0_8, %c0_9], %12 {strides = array<i32>} : memref<240x128xf32, #tpu.memory_space<vmem>>, vector<240x128xf32>,
    %cst_10 = arith.constant 0.000000e+00 : f32
    %14 = vector.broadcast %cst_10 : f32 to vector<192x128xf32>
    %c0_11 = arith.constant 0 : index
    %c0_12 = arith.constant 0 : index
    %15 = vector.load %arg8[%c0_11, %c0_12] : memref<240x128xf32, #tpu.memory_space<vmem>>, vector<192x128xf32>
    %c0_13 = arith.constant 0 : index
    %c0_14 = arith.constant 0 : index
    %c0_15 = arith.constant 0 : index
    %16 = vector.load %arg5[%c0_13, %c0_14, %c0_15] : memref<3x128x128xf32, #tpu.memory_space<vmem>>, vector<1x128x128xf32>
    %17 = vector.shape_cast %16 : vector<1x128x128xf32> to vector<128x128xf32>
    %cst_16 = arith.constant dense<0.000000e+00> : vector<192x128xf32>
    %18 = tpu.matmul %15, %17, %cst_16 {dimension_numbers = #tpu.dot_dimension_numbers<[1], [0], [0], [1], [0, 0, 1, 1], [], []>} : vector<192x128xf32>, vector<128x128xf32>, vector<192x128xf32> -> vector<192x128xf32>
    %19 = arith.addf %14, %18 : vector<192x128xf32>
    %c24 = arith.constant 24 : index
    %c0_17 = arith.constant 0 : index
    %20 = vector.load %arg8[%c24, %c0_17] : memref<240x128xf32, #tpu.memory_space<vmem>>, vector<192x128xf32>
    %c1 = arith.constant 1 : index
    %c0_18 = arith.constant 0 : index
    %c0_19 = arith.constant 0 : index
    %21 = vector.load %arg5[%c1, %c0_18, %c0_19] : memref<3x128x128xf32, #tpu.memory_space<vmem>>, vector<1x128x128xf32>
    %22 = vector.shape_cast %21 : vector<1x128x128xf32> to vector<128x128xf32>
    %cst_20 = arith.constant dense<0.000000e+00> : vector<192x128xf32>
    %23 = tpu.matmul %20, %22, %cst_20 {dimension_numbers = #tpu.dot_dimension_numbers<[1], [0], [0], [1], [0, 0, 1, 1], [], []>} : vector<192x128xf32>, vector<128x128xf32>, vector<192x128xf32> -> vector<192x128xf32>
    %24 = arith.addf %19, %23 : vector<192x128xf32>
    %c48 = arith.constant 48 : index
    %c0_21 = arith.constant 0 : index
    %25 = vector.load %arg8[%c48, %c0_21] : memref<240x128xf32, #tpu.memory_space<vmem>>, vector<192x128xf32>
    %c2 = arith.constant 2 : index
    %c0_22 = arith.constant 0 : index
    %c0_23 = arith.constant 0 : index
    %26 = vector.load %arg5[%c2, %c0_22, %c0_23] : memref<3x128x128xf32, #tpu.memory_space<vmem>>, vector<1x128x128xf32>
    %27 = vector.shape_cast %26 : vector<1x128x128xf32> to vector<128x128xf32>
    %cst_24 = arith.constant dense<0.000000e+00> : vector<192x128xf32>
    %28 = tpu.matmul %25, %27, %cst_24 {dimension_numbers = #tpu.dot_dimension_numbers<[1], [0], [0], [1], [0, 0, 1, 1], [], []>} : vector<192x128xf32>, vector<128x128xf32>, vector<192x128xf32> -> vector<192x128xf32>
    %29 = arith.addf %24, %28 : vector<192x128xf32>
    %c0_25 = arith.constant 0 : index
    %c0_26 = arith.constant 0 : index
    %30 = vector.load %arg6[%c0_25, %c0_26] : memref<1x128xf32, #tpu.memory_space<vmem>>, vector<1x128xf32>
    %31 = vector.broadcast %30 : vector<1x128xf32> to vector<192x128xf32>
    %32 = arith.addf %29, %31 : vector<192x128xf32>
    %cst_27 = arith.constant 0.000000e+00 : f32
    %33 = vector.broadcast %cst_27 : f32 to vector<192x128xf32>
    %34 = arith.maximumf %32, %33 : vector<192x128xf32>
    %c0_28 = arith.constant 0 : index
    %c0_29 = arith.constant 0 : index
    %c0_30 = arith.constant 0 : index
    %c0_31 = arith.constant 0 : index
    %35 = vector.load %arg7[%c0_28, %c0_29, %c0_30, %c0_31] : memref<1x1x192x128xf32, #tpu.memory_space<vmem>>, vector<1x1x192x128xf32>
    %36 = vector.shape_cast %35 : vector<1x1x192x128xf32> to vector<192x128xf32>
    %37 = vector.shape_cast %34 : vector<192x128xf32> to vector<1x1x192x128xf32>
    tpu.vector_store %arg7[%c0_28, %c0_29, %c0_30, %c0_31], %37 {strides = array<i32>} : memref<1x1x192x128xf32, #tpu.memory_space<vmem>>, vector<1x1x192x128xf32>,
    return
  }
  func.func @transform_0(%arg0: i32, %arg1: i32) -> (i32, i32, i32, i32) {
    %c0_i32 = arith.constant 0 : i32
    %c0_i32_0 = arith.constant 0 : i32
    %c0_i32_1 = arith.constant 0 : i32
    return %arg0, %arg1, %c0_i32, %c0_i32_0 : i32, i32, i32, i32
  }
  func.func @transform_1(%arg0: i32, %arg1: i32) -> (i32, i32) {
    %c0_i32 = arith.constant 0 : i32
    %c0_i32_0 = arith.constant 0 : i32
    %c0_i32_1 = arith.constant 0 : i32
    return %c0_i32, %c0_i32_0 : i32, i32
  }
  func.func @transform_2(%arg0: i32, %arg1: i32) -> (i32, i32) {
    %c0_i32 = arith.constant 0 : i32
    %c0_i32_0 = arith.constant 0 : i32
    %c0_i32_1 = arith.constant 0 : i32
    return %c0_i32, %c0_i32_0 : i32, i32
  }
  func.func @transform_3(%arg0: i32, %arg1: i32) -> (i32, i32, i32) {
    %c0_i32 = arith.constant 0 : i32
    %c0_i32_0 = arith.constant 0 : i32
    %c0_i32_1 = arith.constant 0 : i32
    %c0_i32_2 = arith.constant 0 : i32
    return %c0_i32, %c0_i32_0, %c0_i32_1 : i32, i32, i32
  }
  func.func @transform_4(%arg0: i32, %arg1: i32) -> (i32, i32) {
    %c0_i32 = arith.constant 0 : i32
    %c0_i32_0 = arith.constant 0 : i32
    %c0_i32_1 = arith.constant 0 : i32
    return %c0_i32, %c0_i32_0 : i32, i32
  }
  func.func @transform_5(%arg0: i32, %arg1: i32) -> (i32, i32, i32, i32) {
    %c0_i32 = arith.constant 0 : i32
    %c0_i32_0 = arith.constant 0 : i32
    %c0_i32_1 = arith.constant 0 : i32
    return %arg0, %arg1, %c0_i32, %c0_i32_0 : i32, i32, i32, i32
  }
}

module attributes {stable_mosaic.version = 11 : i64} {
  func.func @kernel(%arg0: i32, %arg1: i32, %arg2: memref<1x1x240x128xf32, #tpu.memory_space<vmem>>, %arg3: memref<128x128xf32, #tpu.memory_space<vmem>>, %arg4: memref<1x128xf32, #tpu.memory_space<vmem>>, %arg5: memref<3x128x128xf32, #tpu.memory_space<vmem>>, %arg6: memref<1x128xf32, #tpu.memory_space<vmem>>, %arg7: memref<1x1x192x128xf32, #tpu.memory_space<vmem>>, %arg8: memref<240x128xf32, #tpu.memory_space<vmem>>) attributes {dimension_semantics = [#tpu.dimension_semantics<parallel>, #tpu.dimension_semantics<parallel>], iteration_bounds = array<i64: 2, 2>, scalar_prefetch = 0 : i64, scratch_operands = 1 : i64, tpu.core_type = #tpu.core_type<tc>, window_params = [{transform_indices = @transform_0, window_bounds = array<i64: 1, 1, 240, 128>}, {pipeline_mode = #tpu.pipeline_mode<synchronous>, transform_indices = @transform_1, window_bounds = array<i64: 128, 128>}, {pipeline_mode = #tpu.pipeline_mode<synchronous>, transform_indices = @transform_2, window_bounds = array<i64: 1, 128>}, {pipeline_mode = #tpu.pipeline_mode<synchronous>, transform_indices = @transform_3, window_bounds = array<i64: 3, 128, 128>}, {pipeline_mode = #tpu.pipeline_mode<synchronous>, transform_indices = @transform_4, window_bounds = array<i64: 1, 128>}, {transform_indices = @transform_5, window_bounds = array<i64: 1, 1, 192, 128>}]} {
    %c0 = arith.constant 0 : index
    %c0_0 = arith.constant 0 : index
    %c0_1 = arith.constant 0 : index
    %c0_2 = arith.constant 0 : index
    %0 = vector.load %arg2[%c0, %c0_0, %c0_1, %c0_2] : memref<1x1x240x128xf32, #tpu.memory_space<vmem>>, vector<1x1x240x128xf32>
    %1 = vector.shape_cast %0 : vector<1x1x240x128xf32> to vector<240x128xf32>
    %c0_3 = arith.constant 0 : index
    %c0_4 = arith.constant 0 : index
    %2 = vector.load %arg3[%c0_3, %c0_4] : memref<128x128xf32, #tpu.memory_space<vmem>>, vector<128x128xf32>
    %cst = arith.constant dense<0.000000e+00> : vector<240x128xf32>
    %3 = tpu.matmul %1, %2, %cst {dimension_numbers = #tpu.dot_dimension_numbers<[1], [0], [0], [1], [0, 0, 1, 1], [], []>} : vector<240x128xf32>, vector<128x128xf32>, vector<240x128xf32> -> vector<240x128xf32>
    %c0_5 = arith.constant 0 : index
    %c0_6 = arith.constant 0 : index
    %4 = vector.load %arg4[%c0_5, %c0_6] : memref<1x128xf32, #tpu.memory_space<vmem>>, vector<1x128xf32>
    %5 = vector.broadcast %4 : vector<1x128xf32> to vector<240x128xf32>
    %6 = arith.addf %3, %5 : vector<240x128xf32>
    %7 = tpu.iota {dimensions = array<i32: 1>} : vector<240x128xi32>
    %c24_i32 = arith.constant 24 : i32
    %8 = vector.broadcast %c24_i32 : i32 to vector<240x128xi32>
    %9 = arith.cmpi slt, %7, %8 : vector<240x128xi32>
    %cst_7 = arith.constant 0.000000e+00 : f32
    %10 = vector.broadcast %cst_7 : f32 to vector<240x128xf32>
    %11 = arith.maximumf %6, %10 : vector<240x128xf32>
    %12 = arith.select %9, %11, %6 : vector<240x128xi1>, vector<240x128xf32>
    %c0_8 = arith.constant 0 : index
    %c0_9 = arith.constant 0 : index
    %13 = vector.load %arg8[%c0_8, %c0_9] : memref<240x128xf32, #tpu.memory_space<vmem>>, vector<240x128xf32>
    tpu.vector_store %arg8[%c0_8, %c0_9], %12 {strides = array<i32>} : memref<240x128xf32, #tpu.memory_space<vmem>>, vector<240x128xf32>,
    %cst_10 = arith.constant 0.000000e+00 : f32
    %14 = vector.broadcast %cst_10 : f32 to vector<192x128xf32>
    %c0_11 = arith.constant 0 : index
    %c0_12 = arith.constant 0 : index
    %15 = vector.load %arg8[%c0_11, %c0_12] : memref<240x128xf32, #tpu.memory_space<vmem>>, vector<192x128xf32>
    %c0_13 = arith.constant 0 : index
    %c0_14 = arith.constant 0 : index
    %c0_15 = arith.constant 0 : index
    %16 = vector.load %arg5[%c0_13, %c0_14, %c0_15] : memref<3x128x128xf32, #tpu.memory_space<vmem>>, vector<1x128x128xf32>
    %17 = vector.shape_cast %16 : vector<1x128x128xf32> to vector<128x128xf32>
    %cst_16 = arith.constant dense<0.000000e+00> : vector<192x128xf32>
    %18 = tpu.matmul %15, %17, %cst_16 {dimension_numbers = #tpu.dot_dimension_numbers<[1], [0], [0], [1], [0, 0, 1, 1], [], []>} : vector<192x128xf32>, vector<128x128xf32>, vector<192x128xf32> -> vector<192x128xf32>
    %19 = arith.addf %14, %18 : vector<192x128xf32>
    %c24 = arith.constant 24 : index
    %c0_17 = arith.constant 0 : index
    %20 = vector.load %arg8[%c24, %c0_17] : memref<240x128xf32, #tpu.memory_space<vmem>>, vector<192x128xf32>
    %c1 = arith.constant 1 : index
    %c0_18 = arith.constant 0 : index
    %c0_19 = arith.constant 0 : index
    %21 = vector.load %arg5[%c1, %c0_18, %c0_19] : memref<3x128x128xf32, #tpu.memory_space<vmem>>, vector<1x128x128xf32>
    %22 = vector.shape_cast %21 : vector<1x128x128xf32> to vector<128x128xf32>
    %cst_20 = arith.constant dense<0.000000e+00> : vector<192x128xf32>
    %23 = tpu.matmul %20, %22, %cst_20 {dimension_numbers = #tpu.dot_dimension_numbers<[1], [0], [0], [1], [0, 0, 1, 1], [], []>} : vector<192x128xf32>, vector<128x128xf32>, vector<192x128xf32> -> vector<192x128xf32>
    %24 = arith.addf %19, %23 : vector<192x128xf32>
    %c48 = arith.constant 48 : index
    %c0_21 = arith.constant 0 : index
    %25 = vector.load %arg8[%c48, %c0_21] : memref<240x128xf32, #tpu.memory_space<vmem>>, vector<192x128xf32>
    %c2 = arith.constant 2 : index
    %c0_22 = arith.constant 0 : index
    %c0_23 = arith.constant 0 : index
    %26 = vector.load %arg5[%c2, %c0_22, %c0_23] : memref<3x128x128xf32, #tpu.memory_space<vmem>>, vector<1x128x128xf32>
    %27 = vector.shape_cast %26 : vector<1x128x128xf32> to vector<128x128xf32>
    %cst_24 = arith.constant dense<0.000000e+00> : vector<192x128xf32>
    %28 = tpu.matmul %25, %27, %cst_24 {dimension_numbers = #tpu.dot_dimension_numbers<[1], [0], [0], [1], [0, 0, 1, 1], [], []>} : vector<192x128xf32>, vector<128x128xf32>, vector<192x128xf32> -> vector<192x128xf32>
    %29 = arith.addf %24, %28 : vector<192x128xf32>
    %c0_25 = arith.constant 0 : index
    %c0_26 = arith.constant 0 : index
    %30 = vector.load %arg6[%c0_25, %c0_26] : memref<1x128xf32, #tpu.memory_space<vmem>>, vector<1x128xf32>
    %31 = vector.broadcast %30 : vector<1x128xf32> to vector<192x128xf32>
    %32 = arith.addf %29, %31 : vector<192x128xf32>
    %cst_27 = arith.constant 0.000000e+00 : f32
    %33 = vector.broadcast %cst_27 : f32 to vector<192x128xf32>
    %34 = arith.maximumf %32, %33 : vector<192x128xf32>
    %c0_28 = arith.constant 0 : index
    %c0_29 = arith.constant 0 : index
    %c0_30 = arith.constant 0 : index
    %c0_31 = arith.constant 0 : index
    %35 = vector.load %arg7[%c0_28, %c0_29, %c0_30, %c0_31] : memref<1x1x192x128xf32, #tpu.memory_space<vmem>>, vector<1x1x192x128xf32>
    %36 = vector.shape_cast %35 : vector<1x1x192x128xf32> to vector<192x128xf32>
    %37 = vector.shape_cast %34 : vector<192x128xf32> to vector<1x1x192x128xf32>
    tpu.vector_store %arg7[%c0_28, %c0_29, %c0_30, %c0_31], %37 {strides = array<i32>} : memref<1x1x192x128xf32, #tpu.memory_space<vmem>>, vector<1x1x192x128xf32>,
    return
  }
  func.func @transform_0(%arg0: i32, %arg1: i32) -> (i32, i32, i32, i32) {
    %c0_i32 = arith.constant 0 : i32
    %c0_i32_0 = arith.constant 0 : i32
    %c0_i32_1 = arith.constant 0 : i32
    return %arg0, %arg1, %c0_i32, %c0_i32_0 : i32, i32, i32, i32
  }
  func.func @transform_1(%arg0: i32, %arg1: i32) -> (i32, i32) {
    %c0_i32 = arith.constant 0 : i32
    %c0_i32_0 = arith.constant 0 : i32
    %c0_i32_1 = arith.constant 0 : i32
    return %c0_i32, %c0_i32_0 : i32, i32
  }
  func.func @transform_2(%arg0: i32, %arg1: i32) -> (i32, i32) {
    %c0_i32 = arith.constant 0 : i32
    %c0_i32_0 = arith.constant 0 : i32
    %c0_i32_1 = arith.constant 0 : i32
    return %c0_i32, %c0_i32_0 : i32, i32
  }
  func.func @transform_3(%arg0: i32, %arg1: i32) -> (i32, i32, i32) {
    %c0_i32 = arith.constant 0 : i32
    %c0_i32_0 = arith.constant 0 : i32
    %c0_i32_1 = arith.constant 0 : i32
    %c0_i32_2 = arith.constant 0 : i32
    return %c0_i32, %c0_i32_0, %c0_i32_1 : i32, i32, i32
  }
  func.func @transform_4(%arg0: i32, %arg1: i32) -> (i32, i32) {
    %c0_i32 = arith.constant 0 : i32
    %c0_i32_0 = arith.constant 0 : i32
    %c0_i32_1 = arith.constant 0 : i32
    return %c0_i32, %c0_i32_0 : i32, i32
  }
  func.func @transform_5(%arg0: i32, %arg1: i32) -> (i32, i32, i32, i32) {
    %c0_i32 = arith.constant 0 : i32
    %c0_i32_0 = arith.constant 0 : i32
    %c0_i32_1 = arith.constant 0 : i32
    return %arg0, %arg1, %c0_i32, %c0_i32_0 : i32, i32, i32, i32
  }
}

</mosaic_0001>

<bundles_post_ra>
// kernel: tpu_custom_call.1
= control target key start
LH: loop header
LB: loop body
LE: loop exit
PB: predicated region body
PF: predicated region fallthrough
CT: control target
= control target key end

     0   :  { %s3192_s0 = inlined_call_operand.hbm [shape: f32[2,2,240,128], index: 0, kind: input, shape index: {}]   ;;  %s3193_s1 = inlined_call_operand.hbm [shape: f32[128,128], index: 1, kind: input, shape index: {}]   ;;  %s3194_s2 = inlined_call_operand.vmem [shape: f32[1,128], index: 2, kind: input, shape index: {}]   ;;  %s3195_s3 = inlined_call_operand.hbm [shape: f32[3,128,128], index: 3, kind: input, shape index: {}]   ;;  %s3196_s4 = inlined_call_operand.vmem [shape: f32[1,128], index: 4, kind: input, shape index: {}]   ;;  %s3197_s5 = inlined_call_operand.hbm [shape: f32[2,2,192,128], index: 5, kind: output, shape index: {}]  }
   0x1   :  { %3209 = sst [smem:[#allocation18_spill]] %s3193_s1 }
   0x2   :  { %3210 = sst [smem:[#allocation19_spill]] %s3195_s3 }
   0x3   :  { %10 = vsyncpa [#allocation4], 0 }
   0x4   :  { %12 = vsyncpa [#allocation4 + $0x1], 0 }
   0x5   :  { %13 = vsyncpa [#allocation7], 0 }
   0x6   :  { %14 = vsyncpa [#allocation5], 0 }
   0x7   :  { %16 = vsyncpa [#allocation5 + $0x1], 0  ;;  %s2527_s18 = smov 0   ;;  %s2529_s19 = smov 0  }
   0x8   :  { %s2531_s20 = smov 0   ;;  %s2533_s21 = smov 0  }
   0x9   :  { %s2535_s22 = smov 0   ;;  %s2537_s23 = smov 0  }
   0xa   :  { %s2539_s24 = smov 0   ;;  %s2541_s25 = smov 0  }
   0xb LB: > { %3211 = sst [smem:[#allocation13_spill]] %s2459_s18  ;;  %s1535_s26 = sadd.s32 4294967295, %s2487_s25   ;;  %s2487_s25 = sphi %s2541_s25, %s22_s25   ;;  %s2483_s24 = sphi %s2539_s24, %s3243_s24   ;;  %s2479_s23 = sphi %s2537_s23, %s3237_s23   ;;  %s2475_s22 = sphi %s2535_s22, %s3242_s22   ;;  %s2471_s21 = sphi %s2533_s21, %s3236_s21   ;;  %s2467_s20 = sphi %s2531_s20, %s3241_s20   ;;  %s2463_s19 = sphi %s2529_s19, %s3240_s19   ;;  %s2459_s18 = sphi %s2527_s18, %s3239_s18  }
   0xc   : > { %3212 = sst [smem:[#allocation14_spill]] %s2479_s23  ;;  %s1536_s27 = sadd.s32 4294967294, %s2487_s25  }
   0xd   : > { %p56_p0 = scmp.ne.s32.totalorder %s2463_s19, %s2459_s18  ;;  %p2571_p1 = scmp.eq.s32.totalorder %s1535_s26, 0 }
   0xe   : > { %p2575_p2 = scmp.eq.s32.totalorder %s1535_s26, 3  ;;  %p172_p3 = scmp.eq.s32.totalorder %s1536_s27, 3 }
   0xf   : > { %s3213_s28 = scalar_select %p2571_p1, 1, 0 }
  0x10   : > { %s3214_s29 = scalar_select %p2575_p2, 1, 0 }
  0x11   : > { %p2581_p4 = por %p2571_p1, %p56_p0  ;;  %p1537_p5 = scmp.ge.s32.totalorder %s2487_s25, 1 }
  0x12   : > { %p2586_p6 = por %p172_p3, %p56_p0  ;;  %p179_p7 = scmp.lt.s32.totalorder %s2487_s25, 5 }
  0x13   : > { %s3215_s30 = scalar_select %p2581_p4, 1, 0 }
  0x14   : > { %s3216_s6 = scalar_select %p2586_p6, 1, 0 }
  0x15   : > { %p2591_p8 = pnand %p1537_p5, %p179_p7  ;;  %s2489_s8 = smov [#allocation6]  }
  0x16   : > { %3217 = sst [smem:[#allocation15_spill]] %s3216_s6  ;;  %s191_s9 = sshll.u32 %s2489_s8, 4  ;;  %s192_s9 = int_to_ptr.vmem [resolvable:$true] %s191_s9 }
  0x17   : > { %s3218_s7 = scalar_select %p2591_p8, 1, 0 }
  0x18   : > { %p2208_p9 = pneg %p2591_p8  ;;  %s2490_s11 = smov [#allocation8]  }
  0x19   : > { %s207_s12 = sshll.u32 %s2490_s11, 4  ;;  %s3220_s1 = sld [smem:[#allocation18_spill]]  ;;  %s2603_s12 = int_to_ptr.vmem [resolvable:$true] %s207_s12 }
  0x1a   : > { %p2599_p10 = pnand %p2208_p9, %p2571_p1 }
  0x1c   : > { %p2301_p12 = pneg %p2599_p10 }
  0x1f   : > { %s2299_s15 = scalar_lea.hbm %s3220_s1, 2048 }
  0x20   : > { %p2300_p11 = scmp.ne.s32.totalorder %s3220_s1, %s2299_s15  ;;  %p2306_p3 = scmp.lt.u32.totalorder %s2299_s15, %s3220_s1 }
  0x22   : > { %p2302_p13 = pnand %p2301_p12, %p2300_p11 }
  0x24   : > { %p2303_p0 = pneg %p2302_p13 }
  0x26   : > { %p2308_p5 = pnand %p2306_p3, %p2303_p0 }
  0x28   : > { %2311 = shalt.err (!%p2308_p5)
}
  0x29   : > { %s2312_s8 = scalar_lea.vmem %s192_s9, 2048  ;;  %p2320_p1 = scmp.lt.s32.totalorder %s192_s9, %s192_s9 }
  0x2a   : > { %p2313_p7 = scmp.ne.s32.totalorder %s192_s9, %s2312_s8  ;;  %p2321_p4 = scmp.lt.s32.totalorder %s2312_s8, %s2312_s8 }
  0x2c   : > { %p2315_p9 = pnand %p2313_p7, %p2301_p12  ;;  %p2322_p8 = por %p2321_p4, %p2320_p1 }
  0x2e   : > { %p2316_p6 = pneg %p2315_p9 }
  0x30   : > { %p2323_p2 = pnand %p2322_p8, %p2316_p6 }
  0x32   : > { %2326 = shalt.err (!%p2323_p2)
}
  0x33   : > { %s3204_s11 = smov 128   ;;  %s3205_s13 = smov 8  }
  0x34   : > { %2211 = dma.hbm_to_vmem [thread:$0]  (!%p2599_p10), %s3220_s1, 2048, %s192_s9, [#allocation7], %s3204_s11, %s3204_s11, %s3205_s13  }
  0x35   : > { %s3221_s3 = sld [smem:[#allocation19_spill]] }
  0x3b   : > { %s2327_s26 = scalar_lea.hbm %s3221_s3, 6144 }
  0x3c   : > { %p2328_p1 = scmp.ne.s32.totalorder %s3221_s3, %s2327_s26  ;;  %p2334_p6 = scmp.lt.u32.totalorder %s2327_s26, %s3221_s3 }
  0x3e   : > { %p2330_p2 = pnand %p2328_p1, %p2301_p12 }
  0x40   : > { %p2331_p4 = pneg %p2330_p2 }
  0x42   : > { %p2336_p8 = pnand %p2334_p6, %p2331_p4 }
  0x44   : > { %2339 = shalt.err (!%p2336_p8)
}
  0x45   : > { %s2340_s9 = scalar_lea.vmem %s2603_s12, 6144  ;;  %p2348_p3 = scmp.lt.s32.totalorder %s2603_s12, %s2603_s12 }
  0x46   : > { %p2341_p11 = scmp.ne.s32.totalorder %s2603_s12, %s2340_s9  ;;  %p2349_p5 = scmp.lt.s32.totalorder %s2340_s9, %s2340_s9 }
  0x48   : > { %p2343_p13 = pnand %p2341_p11, %p2301_p12  ;;  %p2350_p7 = por %p2349_p5, %p2348_p3 }
  0x4a   : > { %p2344_p0 = pneg %p2343_p13 }
  0x4c   : > { %p2351_p9 = pnand %p2350_p7, %p2344_p0 }
  0x4e   : > { %2354 = shalt.err (!%p2351_p9)
}
  0x4f   : > { %2214 = dma.hbm_to_vmem [thread:$0]  (!%p2599_p10), %s3221_s3, 6144, %s2603_s12, [#allocation7], %s3204_s11, %s3204_s11, %s3205_s13  }
  0x50   : > { %s31_s10 = sadd.s32 1, %s2479_s23  ;;  %s34_s14 = sadd.s32 1, %s2483_s24 }
  0x51   : > { %p32_p12 = scmp.ge.s32.totalorder %s31_s10, 2  ;;  %s43_s15 = sadd.s32 1, %s2467_s20 }
  0x52   : > { %p50_p1 = scmp.ne.s32.totalorder %s2467_s20, %s2463_s19  ;;  %p51_p2 = scmp.eq.s32.totalorder %s2487_s25, 0 }
  0x53   : > { %s3245_s10 = smov (%p32_p12, %s31_s10), 0  ;;  %s3247_s14 = smov (!%p32_p12, %s34_s14), %s2483_s24 }
  0x54   : > { %3222 = sst [smem:[#allocation16_spill]] %s3245_s10  ;;  %s39_s16 = ssub.s32 %s2479_s23, %s3245_s10 }
  0x55   : > { %p2669_p4 = por %p51_p2, %p50_p1  ;;  %p36_p10 = scmp.ge.s32.totalorder %s3247_s14, 2 }
  0x56   : > { %p3224_p6 = scmp.ne.s32.totalorder %s3214_s29, 0  ;;  %p2225_p11 = scmp.lt.s32.totalorder %s2487_s25, 4 }
  0x57   : > { %s224_s26 = sand.u32 1, %s2467_s20   ;;  %s3249_s14 = smov (%p36_p10, %s3247_s14), 0 }
  0x58   : > { %p2675_p8 = por %p3224_p6, %p50_p1  ;;  %3226 = sst [smem:[#allocation17_spill]] %s3249_s14 }
  0x59   : > { %s2189_s27 = smul.u32 240, %s224_s26  ;;  %s38_s8 = ssub.s32 %s2483_s24, %s3249_s14 }
  0x5a   : > { %s2190_s9 = smul.u32 30, %s2479_s23  ;;  %s40_s18 = sor.u32 %s39_s16, %s38_s8 }
  0x5b   : > { %p41_p13 = scmp.eq.s32.totalorder %s40_s18, 0  ;;  %s2191_s6 = smul.u32 60, %s2483_s24 }
  0x5c   : > { %s228_s11 = scalar_lea.vmem [#allocation3], %s2189_s27  ;;  %p2689_p0 = pnand %p2225_p11, %p2669_p4 }
  0x5d   : > { %s237_s13 = sshll.u32 %s228_s11, 4  ;;  %s234_s3 = sadd.s32 %s2191_s6, %s2190_s9  ;;  %s2696_s13 = int_to_ptr.vmem [resolvable:$true] %s237_s13 }
  0x5e   : > { %s2694_s1 = scalar_select %p41_p13, %s2467_s20, %s43_s15  }
  0x5f   : > { %s1541_s10 = sshll.u32 %s234_s3, 7  ;;  %s2703_s11 = scalar_lea.sflag [#allocation4], %s224_s26 }
  0x60   : > { %s2701_s16 = scalar_lea.hbm %s3192_s0, %s1541_s10  ;;  %p2357_p5 = pneg %p2689_p0 }
  0x61   : > { %s2355_s17 = scalar_lea.hbm %s2701_s16, 3840  ;;  %s2360_s23 = scalar_lea.hbm %s3192_s0, 15360 }
  0x62   : > { %p2356_p3 = scmp.ne.s32.totalorder %s2701_s16, %s2355_s17  ;;  %p2361_p12 = scmp.lt.u32.totalorder %s2701_s16, %s3192_s0 }
  0x63   : > { %p2362_p1 = scmp.lt.u32.totalorder %s2360_s23, %s2355_s17  ;;  %p2364_p4 = scmp.lt.u32.totalorder %s2355_s17, %s2701_s16 }
  0x64   : > { %p2358_p7 = pnand %p2357_p5, %p2356_p3 }
  0x65   : > { %p2363_p2 = por %p2362_p1, %p2361_p12 }
  0x66   : > { %p2359_p9 = pneg %p2358_p7 }
  0x67   : > { %p2365_p10 = por %p2364_p4, %p2363_p2 }
  0x69   : > { %p2366_p6 = pnand %p2365_p10, %p2359_p9 }
  0x6b   : > { %2369 = shalt.err (!%p2366_p6)
}
  0x6c   : > { %s2370_s26 = scalar_lea.vmem %s2696_s13, 3840  ;;  %s2493_s27 = smov [#allocation3]  }
  0x6d   : > { %p2371_p11 = scmp.ne.s32.totalorder %s2696_s13, %s2370_s26  ;;  %s2375_s8 = sshll.u32 %s2493_s27, 4  ;;  %s2376_s8 = int_to_ptr.vmem [resolvable:$false] %s2375_s8 }
  0x6e   : > { %s2377_s9 = scalar_lea.vmem %s2376_s8, 7680  ;;  %p2378_p7 = scmp.lt.s32.totalorder %s2696_s13, %s2376_s8 }
  0x6f   : > { %p2373_p13 = pnand %p2371_p11, %p2357_p5  ;;  %p2379_p12 = scmp.lt.s32.totalorder %s2377_s9, %s2370_s26 }
  0x71   : > { %p2374_p3 = pneg %p2373_p13  ;;  %p2380_p1 = por %p2379_p12, %p2378_p7 }
  0x73   : > { %p2381_p2 = pnand %p2380_p1, %p2374_p3 }
  0x75   : > { %2384 = shalt.err (!%p2381_p2)
}
  0x76   : > { %s3228_s18 = smov 8   ;;  %s3229_s6 = smov 128  }
  0x77   : > { %2218 = dma.hbm_to_vmem [thread:$0]  (!%p2689_p0), %s2701_s16, 3840, %s2696_s13, %s2703_s11, %s3229_s6, %s3229_s6, %s3228_s18  }
  0x78   : > { %p3230_p5 = scmp.ne.s32.totalorder %s3218_s7, 0 }
  0x79   : > { %s2737_s17 = sand.u32 (!%p3230_p5), 1, %s2463_s19   ;;  %p3231_p9 = scmp.ne.s32.totalorder (!%p3230_p5), %s3215_s30, 0 }
  0x7a   : > { %249 = sbr.rel (%p3230_p5) target bundleno = 726 (0x2d6), region = 40  ;;  %s252_s15 = scalar_lea.sflag (!%p3230_p5), [#allocation4], %s2737_s17 }
  0x7b   : > { %s2192_s3 = smul.u32 (!%p3230_p5), 240, %s2737_s17 }
  0x7d   : > { %s2741_s23 = scalar_lea.vmem (!%p3230_p5), [#allocation3], %s2192_s3 }
  0x81   : > { %2446 = dma.done.wait (%p3231_p9), %s252_s15, 3840  }
  0x82   : > { %2448 = vsyncadd (%p3231_p9), %s252_s15, 4294963456  ;;  %p3232_p0 = scmp.ne.s32.totalorder %s3213_s28, 0 }
  0x84   : > { %2450 = dma.done.wait (%p3232_p0), [#allocation7], 8192  }
  0x85   : > { %2452 = vsyncadd (%p3232_p0), [#allocation7], 4294959104  ;;  %v320_v0 = vld [vmem:[#allocation6] sm:$0xff]  ;;  %v321_v1 = vld [vmem:[#allocation6 + $0x8] sm:$0xff]  ;;  %s2193_s7 = smul.u32 192, %s2737_s17  ;;  %s1411_s9 = scalar_lea.sflag [#allocation5], %s2737_s17 }
  0x86   : > { %v322_v2 = vld [vmem:[#allocation6 + $0x10] sm:$0xff]  ;;  %v1997_v3 = vpack.c.bf16 %v321_v1, %v320_v0  ;;  %v323_v4 = vld [vmem:[#allocation6 + $0x18] sm:$0xff]  ;;  %v324_v6 = vld [vmem:[#allocation6 + $0x20] sm:$0xff]  ;;  %s2194_s11 = smul.u32 24, %s2471_s21  ;;  %s2494_s6 = smov [#allocation9]  }
  0x87   : > { %v2001_v5 = vpack.c.bf16 %v323_v4, %v322_v2  ;;  %v325_v7 = vld [vmem:[#allocation6 + $0x28] sm:$0xff]  ;;  %v290_v9 = vld [vmem:[%s2741_s23] sm:$0xff]  ;;  %v327_v11 = vld [vmem:[#allocation6 + $0x38] sm:$0xff]  ;;  %s3070_s16 = scalar_lea.vmem [#allocation9], %s2193_s7  ;;  %s2195_s10 = smul.u32 48, %s2475_s22 }
  0x88   : > { %1998 = vmatprep.subr.bf16.mxu0 %v1997_v3  ;;  %v2005_v8 = vpack.c.bf16 %v325_v7, %v324_v6  ;;  %v326_v10 = vld [vmem:[#allocation6 + $0x30] sm:$0xff]  ;;  %1748 = vmatprep.mubr.f32.mxu0 %v290_v9  ;;  %v328_v13 = vld [vmem:[#allocation6 + $0x40] sm:$0xff]  ;;  %v329_v14 = vld [vmem:[#allocation6 + $0x48] sm:$0xff]  ;;  %s1426_s27 = sshll.u32 %s3070_s16, 4  ;;  %s2389_s3 = sshll.u32 %s2494_s6, 4  ;;  %s3136_s27 = int_to_ptr.vmem [resolvable:$true] %s1426_s27  ;;  %s2390_s3 = int_to_ptr.vmem [resolvable:$false] %s2389_s3 }
  0x89   : > { %2000 = vmatpush3.bf16.msra.mxu0 %v1997_v3  ;;  %v2009_v12 = vpack.c.bf16 %v327_v11, %v326_v10  ;;  %v2013_v15 = vpack.c.bf16 %v329_v14, %v328_v13  ;;  %v330_v16 = vld [vmem:[#allocation6 + $0x50] sm:$0xff]  ;;  %v331_v17 = vld [vmem:[#allocation6 + $0x58] sm:$0xff]  ;;  %v695_v18 = vld [vmem:[#allocation8 + $0x80] sm:$0xff]  ;;  %s1423_s14 = sadd.s32 %s2195_s10, %s2194_s11  ;;  %s2385_s18 = scalar_lea.vmem %s3136_s27, 3072 }
  0x8a   : > { %2002 = vmatprep.subr.bf16.mxu0 %v2001_v5  ;;  %v696_v19 = vld [vmem:[#allocation8 + $0x88] sm:$0xff]  ;;  %v697_v21 = vld [vmem:[#allocation8 + $0x90] sm:$0xff]  ;;  %v698_v22 = vld [vmem:[#allocation8 + $0x98] sm:$0xff]  ;;  %v2017_v23 = vpack.c.bf16 %v331_v17, %v330_v16  ;;  %s1547_s26 = sshll.u32 %s1423_s14, 7  ;;  %p2386_p4 = scmp.ne.s32.totalorder %s3136_s27, %s2385_s18 }
  0x8b   : > { %v2029_v20 = vpack.c.bf16 %v696_v19, %v695_v18  ;;  %v2033_v24 = vpack.c.bf16 %v698_v22, %v697_v21  ;;  %v699_v25 = vld [vmem:[#allocation8 + $0xa0] sm:$0xff]  ;;  %v700_v26 = vld [vmem:[#allocation8 + $0xa8] sm:$0xff]  ;;  %v701_v31 = vld [vmem:[#allocation8 + $0xb0] sm:$0xff]  ;;  %s3134_s22 = scalar_lea.hbm %s3197_s5, %s1547_s26  ;;  %s2391_s15 = scalar_lea.vmem %s2390_s3, 6144 }
  0x8c   : > { %v332_v27 = vld [vmem:[#allocation6 + $0x60] sm:$0xff]  ;;  %v333_v28 = vld [vmem:[#allocation6 + $0x68] sm:$0xff]  ;;  %v2037_v29 = vpack.c.bf16 %v700_v26, %v699_v25  ;;  %v702_v32 = vld [vmem:[#allocation8 + $0xb8] sm:$0xff]  ;;  %p2387_p10 = pnand %p2386_p4, %p2675_p8  ;;  %p2392_p11 = scmp.lt.s32.totalorder %s3136_s27, %s2390_s3 }
  0x8d   : > { %2004 = vmatpush3.bf16.msra.mxu0 %v2001_v5  ;;  %2030 = vmatprep.subr.bf16.mxu1 %v2029_v20  ;;  %v2021_v30 = vpack.c.bf16 %v333_v28, %v332_v27  ;;  %v334_v33 = vld [vmem:[#allocation6 + $0x70] sm:$0xff]  ;;  %v335_v34 = vld [vmem:[#allocation6 + $0x78] sm:$0xff]  ;;  %v2041_v35 = vpack.c.bf16 %v702_v32, %v701_v31  ;;  %v703_v37 = vld [vmem:[#allocation8 + $0xc0] sm:$0xff]  ;;  %p2393_p13 = scmp.lt.s32.totalorder %s2391_s15, %s2385_s18 }
  0x8e   : > { %2006 = vmatprep.subr.bf16.mxu0 %v2005_v8  ;;  %2032 = vmatpush3.bf16.msra.mxu1 %v2029_v20  ;;  %v2025_v36 = vpack.c.bf16 %v335_v34, %v334_v33  ;;  %v704_v38 = vld [vmem:[#allocation8 + $0xc8] sm:$0xff]  ;;  %v1106_v39 = vld [vmem:[#allocation8 + $0x100] sm:$0xff]  ;;  %v1108_v43 = vld [vmem:[#allocation8 + $0x110] sm:$0xff]  ;;  %p2388_p6 = pneg %p2387_p10 }
  0x8f   : > { %2034 = vmatprep.subr.bf16.mxu1 %v2033_v24  ;;  %v1107_v40 = vld [vmem:[#allocation8 + $0x108] sm:$0xff]  ;;  %v2045_v41 = vpack.c.bf16 %v704_v38, %v703_v37  ;;  %v1109_v44 = vld [vmem:[#allocation8 + $0x118] sm:$0xff]  ;;  %v292_v46 = vld [vmem:[%s2741_s23 + $0x10] sm:$0xff]  ;;  %p2394_p3 = por %p2393_p13, %p2392_p11 }
  0x90   : > { %v2752_v42 = vpack.c.bf16 %v1107_v40, %v1106_v39  ;;  %v291_v45 = vld [vmem:[%s2741_s23 + $0x8] sm:$0xff]  ;;  %v2757_v47 = vpack.c.bf16 %v1109_v44, %v1108_v43  ;;  %v1110_v48 = vld [vmem:[#allocation8 + $0x120] sm:$0xff]  ;;  %v293_v50 = vld [vmem:[%s2741_s23 + $0x18] sm:$0xff]  ;;  %v558_v43 = vlaneseq }
  0x91   : > { %2008 = vmatpush3.bf16.msra.mxu0 %v2005_v8  ;;  %v1111_v49 = vld [vmem:[#allocation8 + $0x128] sm:$0xff]  ;;  %v294_v51 = vld [vmem:[%s2741_s23 + $0x20] sm:$0xff]  ;;  %v296_v54 = vld [vmem:[%s2741_s23 + $0x30] sm:$0xff]  ;;  %p2395_p7 = pnand %p2394_p3, %p2388_p6 }
  0x92   : > { %2010 = vmatprep.subr.bf16.mxu0 %v2009_v12  ;;  %2036 = vmatpush3.bf16.msra.mxu1 %v2033_v24  ;;  %v2763_v52 = vpack.c.bf16 %v1111_v49, %v1110_v48  ;;  %v295_v53 = vld [vmem:[%s2741_s23 + $0x28] sm:$0xff]  ;;  %v297_v55 = vld [vmem:[%s2741_s23 + $0x38] sm:$0xff]  ;;  %v298_v56 = vld [vmem:[%s2741_s23 + $0x40] sm:$0xff] }
  0x93   : > { %2038 = vmatprep.subr.bf16.mxu1 %v2037_v29  ;;  %v299_v57 = vld [vmem:[%s2741_s23 + $0x48] sm:$0xff]  ;;  %v300_v58 = vld [vmem:[%s2741_s23 + $0x50] sm:$0xff]  ;;  %v301_v59 = vld [vmem:[%s2741_s23 + $0x58] sm:$0xff] }
  0x94   : > { %v302_v60 = vld [vmem:[%s2741_s23 + $0x60] sm:$0xff]  ;;  %v303_v61 = vld [vmem:[%s2741_s23 + $0x68] sm:$0xff]  ;;  %v304_v62 = vld [vmem:[%s2741_s23 + $0x70] sm:$0xff] }
  0x95   : > { %2012 = vmatpush3.bf16.msra.mxu0 %v2009_v12  ;;  %v305_v63 = vld [vmem:[%s2741_s23 + $0x78] sm:$0xff]  ;;  %v306_v0 = vld [vmem:[%s2741_s23 + $0x80] sm:$0xff]  ;;  %v307_v1 = vld [vmem:[%s2741_s23 + $0x88] sm:$0xff] }
  0x96   : > { %2014 = vmatprep.subr.bf16.mxu0 %v2013_v15  ;;  %2040 = vmatpush3.bf16.msra.mxu1 %v2037_v29  ;;  %v308_v2 = vld [vmem:[%s2741_s23 + $0x90] sm:$0xff]  ;;  %v309_v3 = vld [vmem:[%s2741_s23 + $0x98] sm:$0xff]  ;;  %v310_v4 = vld [vmem:[%s2741_s23 + $0xa0] sm:$0xff] }
  0x97   : > { %2042 = vmatprep.subr.bf16.mxu1 %v2041_v35  ;;  %v311_v5 = vld [vmem:[%s2741_s23 + $0xa8] sm:$0xff]  ;;  %v312_v6 = vld [vmem:[%s2741_s23 + $0xb0] sm:$0xff]  ;;  %v313_v7 = vld [vmem:[%s2741_s23 + $0xb8] sm:$0xff] }
  0x98   : > { %v314_v8 = vld [vmem:[%s2741_s23 + $0xc0] sm:$0xff]  ;;  %v315_v9 = vld [vmem:[%s2741_s23 + $0xc8] sm:$0xff]  ;;  %v316_v10 = vld [vmem:[%s2741_s23 + $0xd0] sm:$0xff] }
  0x99   : > { %2016 = vmatpush3.bf16.msra.mxu0 %v2013_v15  ;;  %v317_v11 = vld [vmem:[%s2741_s23 + $0xd8] sm:$0xff]  ;;  %v318_v12 = vld [vmem:[%s2741_s23 + $0xe0] sm:$0xff]  ;;  %v319_v13 = vld [vmem:[%s2741_s23 + $0xe8] sm:$0xff] }
  0x9a   : > { %2018 = vmatprep.subr.bf16.mxu0 %v2017_v23  ;;  %2044 = vmatpush3.bf16.msra.mxu1 %v2041_v35  ;;  %v1112_v14 = vld [vmem:[#allocation8 + $0x130] sm:$0xff]  ;;  %v1113_v15 = vld [vmem:[#allocation8 + $0x138] sm:$0xff]  ;;  %v1114_v20 = vld [vmem:[#allocation8 + $0x140] sm:$0xff] }
  0x9b   : > { %2046 = vmatprep.subr.bf16.mxu1 %v2045_v41  ;;  %v2793_v16 = vpack.c.bf16 %v1113_v15, %v1112_v14  ;;  %v705_v17 = vld [vmem:[#allocation8 + $0xd0] sm:$0xff]  ;;  %v706_v18 = vld [vmem:[#allocation8 + $0xd8] sm:$0xff]  ;;  %v1115_v21 = vld [vmem:[#allocation8 + $0x148] sm:$0xff] }
  0x9c   : > { %v2049_v19 = vpack.c.bf16 %v706_v18, %v705_v17  ;;  %v2797_v22 = vpack.c.bf16 %v1115_v21, %v1114_v20  ;;  %v708_v24 = vld [vmem:[#allocation8 + $0xe8] sm:$0xff]  ;;  %v1116_v26 = vld [vmem:[#allocation8 + $0x150] sm:$0xff]  ;;  %v1117_v27 = vld [vmem:[#allocation8 + $0x158] sm:$0xff] }
  0x9d   : > { %2020 = vmatpush3.bf16.msra.mxu0 %v2017_v23  ;;  %v707_v23 = vld [vmem:[#allocation8 + $0xe0] sm:$0xff]  ;;  %v2801_v28 = vpack.c.bf16 %v1117_v27, %v1116_v26  ;;  %v709_v29 = vld [vmem:[#allocation8 + $0xf0] sm:$0xff]  ;;  %v1119_v33 = vld [vmem:[#allocation8 + $0x168] sm:$0xff] }
  0x9e   : > { %2022 = vmatprep.subr.bf16.mxu0 %v2021_v30  ;;  %2048 = vmatpush3.bf16.msra.mxu1 %v2045_v41  ;;  %v2053_v25 = vpack.c.bf16 %v708_v24, %v707_v23  ;;  %v1118_v32 = vld [vmem:[#allocation8 + $0x160] sm:$0xff]  ;;  %v1120_v35 = vld [vmem:[#allocation8 + $0x170] sm:$0xff]  ;;  %v676_v39 = vld [vmem:[#allocation8 + $0x8] sm:$0xff] }
  0x9f   : > { %2050 = vmatprep.subr.bf16.mxu1 %v2049_v19  ;;  %v2805_v34 = vpack.c.bf16 %v1119_v33, %v1118_v32  ;;  %v675_v38 = vld [vmem:[#allocation8] sm:$0xff]  ;;  %v681_v18 = vld [vmem:[#allocation8 + $0x30] sm:$0xff]  ;;  %v684_v32 = vld [vmem:[#allocation8 + $0x48] sm:$0xff] }
  0xa0   : > { %v2061_v40 = vpack.c.bf16 %v676_v39, %v675_v38 }
  0xa1   : > { %2024 = vmatpush3.bf16.msra.mxu0 %v2021_v30  ;;  %v710_v30 = vld [vmem:[#allocation8 + $0xf8] sm:$0xff] }
  0xa2   : > { %2026 = vmatprep.subr.bf16.mxu0 %v2025_v36  ;;  %2052 = vmatpush3.bf16.msra.mxu1 %v2049_v19  ;;  %v2057_v31 = vpack.c.bf16 %v710_v30, %v709_v29  ;;  %v682_v19 = vld [vmem:[#allocation8 + $0x38] sm:$0xff] }
  0xa3   : > { %2054 = vmatprep.subr.bf16.mxu1 %v2053_v25  ;;  %v2073_v27 = vpack.c.bf16 %v682_v19, %v681_v18 }
  0xa5   : > { %2028 = vmatpush3.bf16.msra.mxu0 %v2025_v36  ;;  %v1121_v36 = vld [vmem:[#allocation8 + $0x178] sm:$0xff] }
  0xa6   : > { %2094 = vmatprep.subr.bf16.mxu0 %v2752_v42  ;;  %2056 = vmatpush3.bf16.msra.mxu1 %v2053_v25  ;;  %v2809_v37 = vpack.c.bf16 %v1121_v36, %v1120_v35 }
  0xa7   : > { %2058 = vmatprep.subr.bf16.mxu1 %v2057_v31 }
  0xa8   : > { %1749 = vmatmul.mubr.f32.vlgmr.msra.gmra.mrb[0].mxu0 %v291_v45  ;;  %v2820_v45 = vld [vmem:[%s3194_s2] ss:$0 sm:$0xff] }
  0xa9   : > { %1751 = vmatprep.mubr.f32.mxu0 %v292_v46  ;;  %2096 = vmatpush3.bf16.msra.mxu0 %v2752_v42  ;;  %v2822_v46 = vand.u32 127, %v558_v43 }
  0xaa   : > { %2098 = vmatprep.subr.bf16.mxu0 %v2757_v47  ;;  %2060 = vmatpush3.bf16.msra.mxu1 %v2057_v31  ;;  %v683_v31 = vld [vmem:[#allocation8 + $0x40] sm:$0xff] }
  0xab   : > { %2062 = vmatprep.subr.bf16.mxu1 %v2061_v40  ;;  %vm560_vm0 = vcmp.lt.s32.totalorder %v2822_v46, 24  ;;  %v2077_v43 = vpack.c.bf16 %v684_v32, %v683_v31 }
  0xac   : > { %1752 = vmatmul.mubr.f32.gmra.mrb[2].mxu0 %v293_v50 }
  0xad   : > { %1754 = vmatprep.mubr.f32.mxu0 %v294_v51  ;;  %2100 = vmatpush3.bf16.msra.mxu0 %v2757_v47 }
  0xae   : > { %2102 = vmatprep.subr.bf16.mxu0 %v2763_v52 }
  0xb0   : > { %1755 = vmatmul.mubr.f32.gmra.mrb[4].mxu0 %v295_v53 }
  0xb1   : > { %1757 = vmatprep.mubr.f32.mxu0 %v296_v54  ;;  %2104 = vmatpush3.bf16.msra.mxu0 %v2763_v52 }
  0xb2   : > { %2106 = vmatprep.subr.bf16.mxu0 %v2793_v16 }
  0xb4   : > { %1758 = vmatmul.mubr.f32.gmra.mrb[6].mxu0 %v297_v55 }
  0xb5   : > { %1760 = vmatprep.mubr.f32.mxu0 %v298_v56  ;;  %2108 = vmatpush3.bf16.msra.mxu0 %v2793_v16 }
  0xb6   : > { %2110 = vmatprep.subr.bf16.mxu0 %v2797_v22 }
  0xb8   : > { %1761 = vmatmul.mubr.f32.gmra.mrb[8].mxu0 %v299_v57 }
  0xb9   : > { %1763 = vmatprep.mubr.f32.mxu0 %v300_v58  ;;  %2112 = vmatpush3.bf16.msra.mxu0 %v2797_v22  ;;  %v677_v58 = vld [vmem:[#allocation8 + $0x10] sm:$0xff] }
  0xba   : > { %2114 = vmatprep.subr.bf16.mxu0 %v2801_v28 }
  0xbc   : > { %1764 = vmatmul.mubr.f32.gmra.mrb[10].mxu0 %v301_v59  ;;  %v678_v59 = vld [vmem:[#allocation8 + $0x18] sm:$0xff] }
  0xbd   : > { %1766 = vmatprep.mubr.f32.mxu0 %v302_v60  ;;  %2116 = vmatpush3.bf16.msra.mxu0 %v2801_v28 }
  0xbe   : > { %2118 = vmatprep.subr.bf16.mxu0 %v2805_v34 }
  0xc0   : > { %1767 = vmatmul.mubr.f32.gmra.mrb[12].mxu0 %v303_v61 }
  0xc1   : > { %1769 = vmatprep.mubr.f32.mxu0 %v304_v62  ;;  %2120 = vmatpush3.bf16.msra.mxu0 %v2805_v34 }
  0xc2   : > { %2122 = vmatprep.subr.bf16.mxu0 %v2809_v37 }
  0xc4   : > { %1770 = vmatmul.mubr.f32.gmra.mrb[14].mxu0 %v305_v63 }
  0xc5   : > { %1772 = vmatprep.mubr.f32.mxu0 %v306_v0  ;;  %2124 = vmatpush3.bf16.msra.mxu0 %v2809_v37 }
  0xc8   : > { %1773 = vmatmul.mubr.f32.gmra.mrb[16].mxu0 %v307_v1  ;;  %v2065_v1 = vpack.c.bf16 %v678_v59, %v677_v58 }
  0xc9   : > { %1775 = vmatprep.mubr.f32.mxu0 %v308_v2 }
  0xcc   : > { %1776 = vmatmul.mubr.f32.gmra.mrb[18].mxu0 %v309_v3 }
  0xcd   : > { %1778 = vmatprep.mubr.f32.mxu0 %v310_v4 }
  0xd0   : > { %1779 = vmatmul.mubr.f32.gmra.mrb[20].mxu0 %v311_v5 }
  0xd1   : > { %1781 = vmatprep.mubr.f32.mxu0 %v312_v6  ;;  %v679_v6 = vld [vmem:[#allocation8 + $0x20] sm:$0xff] }
  0xd4   : > { %1782 = vmatmul.mubr.f32.gmra.mrb[22].mxu0 %v313_v7  ;;  %v680_v7 = vld [vmem:[#allocation8 + $0x28] sm:$0xff] }
  0xd5   : > { %1784 = vmatprep.mubr.f32.mxu0 %v314_v8  ;;  %v2069_v14 = vpack.c.bf16 %v680_v7, %v679_v6 }
  0xd8   : > { %1785 = vmatmul.mubr.f32.gmra.mrb[24].mxu0 %v315_v9 }
  0xd9   : > { %1787 = vmatprep.mubr.f32.mxu0 %v316_v10 }
  0xdc   : > { %1788 = vmatmul.mubr.f32.gmra.mrb[26].mxu0 %v317_v11 }
  0xdd   : > { %1790 = vmatprep.mubr.f32.mxu0 %v318_v12 }
  0xe0   : > { %1791 = vmatmul.mubr.f32.gmra.mrb[28].mxu0 %v319_v13 }
 0x17b   : > { %v2813_v41 = vpop.f32.mrb[0].mxu0 }
 0x17c   : > { %v2815_v44 = vpop.f32.mrb[1].mxu0 }
 0x17f   : > { %v1753_v48 = vpop.f32.mrb[2].mxu0 }
 0x180   : > { %v425_v49 = vadd.f32 %v1753_v48, %v2820_v45  ;;  %v2825_v50 = vpop.f32.mrb[3].mxu0 }
 0x182   : > { %v564_v51 = vmax.f32 %v425_v49, 0.0 }
 0x183   : > { %v1756_v53 = vpop.f32.mrb[4].mxu0 }
 0x184   : > { %v435_v54 = vadd.f32 %v1756_v53, %v2820_v45  ;;  %v429_v55 = vpop.f32.mrb[5].mxu0  ;;  %v2831_v56 = vsel %vm560_vm0, %v564_v51, %v425_v49  ;;  %v685_v51 = vld [vmem:[#allocation8 + $0x50] sm:$0xff]  ;;  %v686_v53 = vld [vmem:[#allocation8 + $0x58] sm:$0xff] }
 0x185   : > { %v430_v57 = vadd.f32 %v2820_v45, %v429_v55  ;;  %1825 = vmatprep.mubr.f32.mxu1 %v2831_v56 }
 0x186   : > { %v566_v60 = vmax.f32 %v435_v54, 0.0 }
 0x187   : > { %v565_v61 = vmax.f32 %v430_v57, 0.0  ;;  %v1759_v62 = vpop.f32.mrb[6].mxu0 }
 0x188   : > { %v445_v63 = vadd.f32 %v1759_v62, %v2820_v45  ;;  %v439_v0 = vpop.f32.mrb[7].mxu0  ;;  %v2844_v5 = vsel %vm560_vm0, %v566_v60, %v435_v54 }
 0x189   : > { %v440_v2 = vadd.f32 %v2820_v45, %v439_v0  ;;  %v2839_v3 = vsel %vm560_vm0, %v565_v61, %v430_v57  ;;  %v2081_v61 = vpack.c.bf16 %v686_v53, %v685_v51  ;;  %v687_v0 = vld [vmem:[#allocation8 + $0x60] sm:$0xff] }
 0x18a   : > { %v568_v4 = vmax.f32 %v445_v63, 0.0  ;;  %1826 = vmatmul.mubr.f32.vlgmr.msra.gmra.mrb[0].mxu1 %v2839_v3 }
 0x18b   : > { %v567_v8 = vmax.f32 %v440_v2, 0.0  ;;  %2064 = vmatpush3.bf16.msra.mxu1 %v2061_v40  ;;  %v1762_v9 = vpop.f32.mrb[8].mxu0  ;;  %1828 = vmatprep.mubr.f32.mxu1 %v2844_v5 }
 0x18c   : > { %v455_v10 = vadd.f32 %v1762_v9, %v2820_v45  ;;  %v449_v11 = vpop.f32.mrb[9].mxu0  ;;  %2066 = vmatprep.subr.bf16.mxu1 %v2065_v1  ;;  %v2857_v17 = vsel %vm560_vm0, %v568_v4, %v445_v63 }
 0x18d   : > { %v450_v12 = vadd.f32 %v2820_v45, %v449_v11  ;;  %v2851_v13 = vsel %vm560_vm0, %v567_v8, %v440_v2 }
 0x18e   : > { %v570_v15 = vmax.f32 %v455_v10, 0.0  ;;  %1829 = vmatmul.mubr.f32.gmra.mrb[2].mxu1 %v2851_v13  ;;  %1961 = vmatprep.mubr.f32.mxu0 %v2851_v13 }
 0x18f   : > { %v569_v20 = vmax.f32 %v450_v12, 0.0  ;;  %v1765_v21 = vpop.f32.mrb[10].mxu0  ;;  %1831 = vmatprep.mubr.f32.mxu1 %v2857_v17  ;;  %1962 = vmatmul.mubr.f32.vlgmr.msra.gmra.mrb[30].mxu0 %v2857_v17 }
 0x190   : > { %v465_v23 = vadd.f32 %v1765_v21, %v2820_v45  ;;  %v459_v24 = vpop.f32.mrb[11].mxu0  ;;  %2068 = vmatpush3.bf16.msra.mxu1 %v2065_v1  ;;  %v2871_v30 = vsel %vm560_vm0, %v570_v15, %v455_v10  ;;  %v688_v1 = vld [vmem:[#allocation8 + $0x68] sm:$0xff]  ;;  %v690_v15 = vld [vmem:[#allocation8 + $0x78] sm:$0xff] }
 0x191   : > { %v460_v25 = vadd.f32 %v2820_v45, %v459_v24  ;;  %v2865_v26 = vsel %vm560_vm0, %v569_v20, %v450_v12  ;;  %2070 = vmatprep.subr.bf16.mxu1 %v2069_v14  ;;  %v2085_v10 = vpack.c.bf16 %v688_v1, %v687_v0 }
 0x192   : > { %v572_v29 = vmax.f32 %v465_v23, 0.0  ;;  %1832 = vmatmul.mubr.f32.gmra.mrb[4].mxu1 %v2865_v26  ;;  %1964 = vmatprep.mubr.f32.mxu0 %v2865_v26 }
 0x193   : > { %v571_v33 = vmax.f32 %v460_v25, 0.0  ;;  %v1768_v35 = vpop.f32.mrb[12].mxu0  ;;  %1834 = vmatprep.mubr.f32.mxu1 %v2871_v30  ;;  %1965 = vmatmul.mubr.f32.gmra.mrb[32].mxu0 %v2871_v30 }
 0x194   : > { %v475_v36 = vadd.f32 %v1768_v35, %v2820_v45  ;;  %v469_v38 = vpop.f32.mrb[13].mxu0  ;;  %2072 = vmatpush3.bf16.msra.mxu1 %v2069_v14  ;;  %v2885_v49 = vsel %vm560_vm0, %v572_v29, %v465_v23  ;;  %v689_v14 = vld [vmem:[#allocation8 + $0x70] sm:$0xff] }
 0x195   : > { %v470_v39 = vadd.f32 %v2820_v45, %v469_v38  ;;  %v2879_v40 = vsel %vm560_vm0, %v571_v33, %v460_v25  ;;  %2074 = vmatprep.subr.bf16.mxu1 %v2073_v27  ;;  %v2089_v25 = vpack.c.bf16 %v690_v15, %v689_v14 }
 0x196   : > { %v574_v48 = vmax.f32 %v475_v36, 0.0  ;;  %1835 = vmatmul.mubr.f32.gmra.mrb[6].mxu1 %v2879_v40  ;;  %1967 = vmatprep.mubr.f32.mxu0 %v2879_v40 }
 0x197   : > { %v573_v54 = vmax.f32 %v470_v39, 0.0  ;;  %v1771_v55 = vpop.f32.mrb[14].mxu0  ;;  %1837 = vmatprep.mubr.f32.mxu1 %v2885_v49  ;;  %1968 = vmatmul.mubr.f32.gmra.mrb[34].mxu0 %v2885_v49 }
 0x198   : > { %v485_v57 = vadd.f32 %v1771_v55, %v2820_v45  ;;  %v479_v58 = vpop.f32.mrb[15].mxu0  ;;  %2076 = vmatpush3.bf16.msra.mxu1 %v2073_v27  ;;  %v2899_v63 = vsel %vm560_vm0, %v574_v48, %v475_v36 }
 0x199   : > { %v480_v59 = vadd.f32 %v2820_v45, %v479_v58  ;;  %v2893_v60 = vsel %vm560_vm0, %v573_v54, %v470_v39  ;;  %2078 = vmatprep.subr.bf16.mxu1 %v2077_v43 }
 0x19a   : > { %v576_v62 = vmax.f32 %v485_v57, 0.0  ;;  %1838 = vmatmul.mubr.f32.gmra.mrb[8].mxu1 %v2893_v60  ;;  %1970 = vmatprep.mubr.f32.mxu0 %v2893_v60 }
 0x19b   : > { %v575_v2 = vmax.f32 %v480_v59, 0.0  ;;  %v1774_v4 = vpop.f32.mrb[16].mxu0  ;;  %1840 = vmatprep.mubr.f32.mxu1 %v2899_v63  ;;  %1971 = vmatmul.mubr.f32.gmra.mrb[36].mxu0 %v2899_v63 }
 0x19c   : > { %v495_v6 = vadd.f32 %v1774_v4, %v2820_v45  ;;  %v489_v7 = vpop.f32.mrb[17].mxu0  ;;  %2080 = vmatpush3.bf16.msra.mxu1 %v2077_v43  ;;  %v2913_v12 = vsel %vm560_vm0, %v576_v62, %v485_v57 }
 0x19d   : > { %v490_v8 = vadd.f32 %v2820_v45, %v489_v7  ;;  %v2907_v9 = vsel %vm560_vm0, %v575_v2, %v480_v59  ;;  %2082 = vmatprep.subr.bf16.mxu1 %v2081_v61 }
 0x19e   : > { %v578_v11 = vmax.f32 %v495_v6, 0.0  ;;  %1841 = vmatmul.mubr.f32.gmra.mrb[10].mxu1 %v2907_v9  ;;  %1973 = vmatprep.mubr.f32.mxu0 %v2907_v9 }
 0x19f   : > { %v577_v18 = vmax.f32 %v490_v8, 0.0  ;;  %v1777_v19 = vpop.f32.mrb[18].mxu0  ;;  %1843 = vmatprep.mubr.f32.mxu1 %v2913_v12  ;;  %1974 = vmatmul.mubr.f32.gmra.mrb[38].mxu0 %v2913_v12 }
 0x1a0   : > { %v505_v20 = vadd.f32 %v1777_v19, %v2820_v45  ;;  %v499_v21 = vpop.f32.mrb[19].mxu0  ;;  %2084 = vmatpush3.bf16.msra.mxu1 %v2081_v61  ;;  %v2927_v29 = vsel %vm560_vm0, %v578_v11, %v495_v6  ;;  %v410_v6 = vadd.f32 %v2820_v45, %v2815_v44  ;;  %v415_v44 = vadd.f32 %v2813_v41, %v2820_v45 }
 0x1a1   : > { %v500_v23 = vadd.f32 %v2820_v45, %v499_v21  ;;  %v2921_v24 = vsel %vm560_vm0, %v577_v18, %v490_v8  ;;  %2086 = vmatprep.subr.bf16.mxu1 %v2085_v10  ;;  %v420_v21 = vadd.f32 %v2820_v45, %v2825_v50 }
 0x1a2   : > { %v580_v27 = vmax.f32 %v505_v20, 0.0  ;;  %1844 = vmatmul.mubr.f32.gmra.mrb[12].mxu1 %v2921_v24  ;;  %1976 = vmatprep.mubr.f32.mxu0 %v2921_v24 }
 0x1a3   : > { %v579_v31 = vmax.f32 %v500_v23, 0.0  ;;  %v1780_v32 = vpop.f32.mrb[20].mxu0  ;;  %1846 = vmatprep.mubr.f32.mxu1 %v2927_v29  ;;  %1977 = vmatmul.mubr.f32.gmra.mrb[40].mxu0 %v2927_v29  ;;  %v563_v50 = vmax.f32 %v420_v21, 0.0 }
 0x1a4   : > { %v515_v33 = vadd.f32 %v1780_v32, %v2820_v45  ;;  %v509_v35 = vpop.f32.mrb[21].mxu0  ;;  %2088 = vmatpush3.bf16.msra.mxu1 %v2085_v10  ;;  %v2941_v43 = vsel %vm560_vm0, %v580_v27, %v505_v20  ;;  %v561_v20 = vmax.f32 %v410_v6, 0.0 }
 0x1a5   : > { %v510_v36 = vadd.f32 %v2820_v45, %v509_v35  ;;  %v2935_v38 = vsel %vm560_vm0, %v579_v31, %v500_v23  ;;  %2090 = vmatprep.subr.bf16.mxu1 %v2089_v25 }
 0x1a6   : > { %v582_v39 = vmax.f32 %v515_v33, 0.0  ;;  %1847 = vmatmul.mubr.f32.gmra.mrb[14].mxu1 %v2935_v38  ;;  %1979 = vmatprep.mubr.f32.mxu0 %v2935_v38 }
 0x1a7   : > { %v581_v48 = vmax.f32 %v510_v36, 0.0  ;;  %v1783_v51 = vpop.f32.mrb[22].mxu0  ;;  %1849 = vmatprep.mubr.f32.mxu1 %v2941_v43  ;;  %1980 = vmatmul.mubr.f32.gmra.mrb[42].mxu0 %v2941_v43 }
 0x1a8   : > { %v525_v53 = vadd.f32 %v1783_v51, %v2820_v45  ;;  %v519_v54 = vpop.f32.mrb[23].mxu0  ;;  %2092 = vmatpush3.bf16.msra.mxu1 %v2089_v25  ;;  %v2956_v59 = vsel %vm560_vm0, %v582_v39, %v515_v33  ;;  %v562_v33 = vmax.f32 %v415_v44, 0.0  ;;  %v591_v39 = vsel %vm560_vm0, %v561_v20, %v410_v6 }
 0x1a9   : > { %v520_v55 = vadd.f32 %v2820_v45, %v519_v54  ;;  %v2949_v57 = vsel %vm560_vm0, %v581_v48, %v510_v36  ;;  %2125 = vmatprep.subr.bf16.mxu1 %v2752_v42 }
 0x1aa   : > { %v584_v58 = vmax.f32 %v525_v53, 0.0  ;;  %1850 = vmatmul.mubr.f32.gmra.mrb[16].mxu1 %v2949_v57  ;;  %1982 = vmatprep.mubr.f32.mxu0 %v2949_v57 }
 0x1ab   : > { %v583_v61 = vmax.f32 %v520_v55, 0.0  ;;  %v1786_v62 = vpop.f32.mrb[24].mxu0  ;;  %1852 = vmatprep.mubr.f32.mxu1 %v2956_v59  ;;  %1983 = vmatmul.mubr.f32.gmra.mrb[44].mxu0 %v2956_v59 }
 0x1ac   : > { %v535_v0 = vadd.f32 %v1786_v62, %v2820_v45  ;;  %v529_v1 = vpop.f32.mrb[25].mxu0  ;;  %v2972_v8 = vsel %vm560_vm0, %v584_v58, %v525_v53  ;;  %v593_v58 = vsel %vm560_vm0, %v563_v50, %v420_v21 }
 0x1ad   : > { %v530_v2 = vadd.f32 %v2820_v45, %v529_v1  ;;  %v2964_v4 = vsel %vm560_vm0, %v583_v61, %v520_v55  ;;  %v592_v55 = vsel %vm560_vm0, %v562_v33, %v415_v44 }
 0x1ae   : > { %v586_v7 = vmax.f32 %v535_v0, 0.0  ;;  %1853 = vmatmul.mubr.f32.gmra.mrb[18].mxu1 %v2964_v4  ;;  %1985 = vmatprep.mubr.f32.mxu0 %v2964_v4 }
 0x1af   : > { %v585_v10 = vmax.f32 %v530_v2, 0.0  ;;  %v1789_v11 = vpop.f32.mrb[26].mxu0  ;;  %1855 = vmatprep.mubr.f32.mxu1 %v2972_v8  ;;  %1986 = vmatmul.mubr.f32.gmra.mrb[46].mxu0 %v2972_v8 }
 0x1b0   : > { %v545_v14 = vadd.f32 %v1789_v11, %v2820_v45  ;;  %v539_v15 = vpop.f32.mrb[27].mxu0  ;;  %v616_v25 = vsel %vm560_vm0, %v586_v7, %v535_v0 }
 0x1b1   : > { %v540_v18 = vadd.f32 %v2820_v45, %v539_v15  ;;  %v615_v19 = vsel %vm560_vm0, %v585_v10, %v530_v2 }
 0x1b2   : > { %v588_v23 = vmax.f32 %v545_v14, 0.0  ;;  %1856 = vmatmul.mubr.f32.gmra.mrb[20].mxu1 %v615_v19  ;;  %1988 = vmatprep.mubr.f32.mxu0 %v615_v19 }
 0x1b3   : > { %v587_v27 = vmax.f32 %v540_v18, 0.0  ;;  %1858 = vmatprep.mubr.f32.mxu1 %v616_v25  ;;  %1989 = vmatmul.mubr.f32.gmra.mrb[48].mxu0 %v616_v25  ;;  %v1792_v31 = vpop.f32.mrb[28].mxu0 }
 0x1b4   : > { %v555_v41 = vadd.f32 %v1792_v31, %v2820_v45  ;;  %v549_v32 = vpop.f32.mrb[29].mxu0  ;;  %v618_v48 = vsel %vm560_vm0, %v588_v23, %v545_v14 }
 0x1b5   : > { %v617_v35 = vsel %vm560_vm0, %v587_v27, %v540_v18  ;;  %v550_v36 = vadd.f32 %v2820_v45, %v549_v32 }
 0x1b6   : > { %1859 = vmatmul.mubr.f32.gmra.mrb[22].mxu1 %v617_v35  ;;  %1991 = vmatprep.mubr.f32.mxu0 %v617_v35  ;;  %v590_v51 = vmax.f32 %v555_v41, 0.0 }
 0x1b7   : > { %1893 = vmatprep.mubr.f32.mxu1 %v591_v39  ;;  %1992 = vmatmul.mubr.f32.gmra.mrb[50].mxu0 %v618_v48  ;;  %v589_v53 = vmax.f32 %v550_v36, 0.0 }
 0x1b8   : > { %v620_v54 = vsel %vm560_vm0, %v590_v51, %v555_v41 }
 0x1b9   : > { %v619_v45 = vsel %vm560_vm0, %v589_v53, %v550_v36 }
 0x1ba   : > { %1894 = vmatmul.mubr.f32.vlgmr.msra.gmra.mrb[0].mxu1 %v592_v55 }
 0x1bb   : > { %2133 = vmatpush3.bf16.msra.mxu1 %v2752_v42  ;;  %1896 = vmatprep.mubr.f32.mxu1 %v593_v58 }
 0x1bc   : > { %2126 = vmatprep.subr.bf16.mxu1 %v2757_v47 }
 0x1be   : > { %1897 = vmatmul.mubr.f32.gmra.mrb[2].mxu1 %v2831_v56 }
 0x1bf   : > { %1899 = vmatprep.mubr.f32.mxu1 %v2839_v3  ;;  %2134 = vmatpush3.bf16.msra.mxu1 %v2757_v47 }
 0x1c0   : > { %2127 = vmatprep.subr.bf16.mxu1 %v2763_v52 }
 0x1c2   : > { %1900 = vmatmul.mubr.f32.gmra.mrb[4].mxu1 %v2844_v5 }
 0x1c3   : > { %1902 = vmatprep.mubr.f32.mxu1 %v2851_v13  ;;  %2135 = vmatpush3.bf16.msra.mxu1 %v2763_v52 }
 0x1c4   : > { %2128 = vmatprep.subr.bf16.mxu1 %v2793_v16 }
 0x1c6   : > { %1903 = vmatmul.mubr.f32.gmra.mrb[6].mxu1 %v2857_v17 }
 0x1c7   : > { %1905 = vmatprep.mubr.f32.mxu1 %v2865_v26  ;;  %2136 = vmatpush3.bf16.msra.mxu1 %v2793_v16 }
 0x1c8   : > { %2129 = vmatprep.subr.bf16.mxu1 %v2797_v22 }
 0x1ca   : > { %1906 = vmatmul.mubr.f32.gmra.mrb[8].mxu1 %v2871_v30 }
 0x1cb   : > { %1908 = vmatprep.mubr.f32.mxu1 %v2879_v40  ;;  %2137 = vmatpush3.bf16.msra.mxu1 %v2797_v22 }
 0x1cc   : > { %2130 = vmatprep.subr.bf16.mxu1 %v2801_v28 }
 0x1ce   : > { %1909 = vmatmul.mubr.f32.gmra.mrb[10].mxu1 %v2885_v49 }
 0x1cf   : > { %1911 = vmatprep.mubr.f32.mxu1 %v2893_v60  ;;  %2138 = vmatpush3.bf16.msra.mxu1 %v2801_v28 }
 0x1d0   : > { %2131 = vmatprep.subr.bf16.mxu1 %v2805_v34 }
 0x1d2   : > { %1912 = vmatmul.mubr.f32.gmra.mrb[12].mxu1 %v2899_v63 }
 0x1d3   : > { %1914 = vmatprep.mubr.f32.mxu1 %v2907_v9  ;;  %2139 = vmatpush3.bf16.msra.mxu1 %v2805_v34 }
 0x1d4   : > { %2132 = vmatprep.subr.bf16.mxu1 %v2809_v37 }
 0x1d6   : > { %1915 = vmatmul.mubr.f32.gmra.mrb[14].mxu1 %v2913_v12 }
 0x1d7   : > { %1917 = vmatprep.mubr.f32.mxu1 %v2921_v24  ;;  %2140 = vmatpush3.bf16.msra.mxu1 %v2809_v37 }
 0x1da   : > { %1918 = vmatmul.mubr.f32.gmra.mrb[16].mxu1 %v2927_v29  ;;  %v3066_v29 = vld [vmem:[%s3196_s4] ss:$0 sm:$0xff] }
 0x1db   : > { %1920 = vmatprep.mubr.f32.mxu1 %v2935_v38 }
 0x1de   : > { %1921 = vmatmul.mubr.f32.gmra.mrb[18].mxu1 %v2941_v43 }
 0x1df   : > { %1923 = vmatprep.mubr.f32.mxu1 %v2949_v57 }
 0x1e2   : > { %1924 = vmatmul.mubr.f32.gmra.mrb[20].mxu1 %v2956_v59 }
 0x1e3   : > { %1926 = vmatprep.mubr.f32.mxu1 %v2964_v4 }
 0x1e6   : > { %1927 = vmatmul.mubr.f32.gmra.mrb[22].mxu1 %v2972_v8 }
 0x1e7   : > { %1994 = vmatprep.mubr.f32.mxu1 %v619_v45 }
 0x1ee   : > { %1995 = vmatmul.mubr.f32.vlgmr.msra.gmra.mrb[22].mxu1 %v620_v54 }
 0x262   : > { %v1963_v42 = vpop.f32.mrb[30].mxu0 }
 0x263   : > { %v1188_v47 = vpop.f32.mrb[31].mxu0 }
 0x266   : > { %v1966_v52 = vpop.f32.mrb[32].mxu0 }
 0x267   : > { %v1198_v16 = vpop.f32.mrb[33].mxu0 }
 0x26a   : > { %v1969_v22 = vpop.f32.mrb[34].mxu0 }
 0x26b   : > { %v1208_v28 = vpop.f32.mrb[35].mxu0 }
 0x26e   : > { %v1972_v34 = vpop.f32.mrb[36].mxu0 }
 0x26f   : > { %v1218_v37 = vpop.f32.mrb[37].mxu0 }
 0x272   : > { %v1975_v46 = vpop.f32.mrb[38].mxu0 }
 0x273   : > { %v1228_v56 = vpop.f32.mrb[39].mxu0 }
 0x276   : > { %v3038_v3 = vpop.f32.mrb[40].mxu0 }
 0x277   : > { %v3040_v5 = vpop.f32.mrb[41].mxu0 }
 0x27a   : > { %v3042_v13 = vpop.f32.mrb[42].mxu0 }
 0x27b   : > { %v3044_v17 = vpop.f32.mrb[43].mxu0 }
 0x27e   : > { %v3046_v26 = vpop.f32.mrb[44].mxu0 }
 0x27f   : > { %v3048_v30 = vpop.f32.mrb[45].mxu0 }
 0x282   : > { %v3050_v40 = vpop.f32.mrb[46].mxu0 }
 0x283   : > { %v3052_v49 = vpop.f32.mrb[47].mxu0 }
 0x286   : > { %v3054_v60 = vpop.f32.mrb[48].mxu0 }
 0x287   : > { %v3056_v63 = vpop.f32.mrb[49].mxu0 }
 0x28a   : > { %v3058_v9 = vpop.f32.mrb[50].mxu0 }
 0x28b   : > { %v3060_v12 = vpop.f32.mrb[51].mxu0 }
 0x28d   : > { %v1895_v24 = vpop.f32.mrb[0].mxu1 }
 0x28e   : > { %v2141_v38 = vadd.f32 %v1963_v42, %v1895_v24  ;;  %v962_v43 = vpop.f32.mrb[1].mxu1 }
 0x28f   : > { %v2142_v57 = vadd.f32 %v1188_v47, %v962_v43 }
 0x290   : > { %v1339_v59 = vadd.f32 %v2141_v38, %v3066_v29 }
 0x291   : > { %v1338_v61 = vadd.f32 %v2142_v57, %v3066_v29  ;;  %v1898_v62 = vpop.f32.mrb[2].mxu1 }
 0x292   : > { %v1363_v0 = vmax.f32 %v1339_v59, 0.0  ;;  %v2143_v1 = vadd.f32 %v1966_v52, %v1898_v62  ;;  %v972_v2 = vpop.f32.mrb[3].mxu1 }
 0x293   : > { %v1362_v4 = vmax.f32 %v1338_v61, 0.0  ;;  %v2144_v6 = vadd.f32 %v1198_v16, %v972_v2 }
 0x294   : > { %1387 = vst [vmem:[%s3070_s16 + $0x8] sm:$0xff] %v1363_v0  ;;  %v1341_v7 = vadd.f32 %v2143_v1, %v3066_v29 }
 0x295   : > { %1386 = vst [vmem:[%s3070_s16] sm:$0xff] %v1362_v4  ;;  %v1340_v8 = vadd.f32 %v2144_v6, %v3066_v29  ;;  %v1901_v10 = vpop.f32.mrb[4].mxu1 }
 0x296   : > { %v1365_v11 = vmax.f32 %v1341_v7, 0.0  ;;  %v2145_v14 = vadd.f32 %v1969_v22, %v1901_v10  ;;  %v982_v15 = vpop.f32.mrb[5].mxu1 }
 0x297   : > { %v1364_v44 = vmax.f32 %v1340_v8, 0.0  ;;  %v2146_v18 = vadd.f32 %v1208_v28, %v982_v15 }
 0x298   : > { %1389 = vst [vmem:[%s3070_s16 + $0x18] sm:$0xff] %v1365_v11  ;;  %v1343_v19 = vadd.f32 %v2145_v14, %v3066_v29 }
 0x299   : > { %1388 = vst [vmem:[%s3070_s16 + $0x10] sm:$0xff] %v1364_v44  ;;  %v1342_v20 = vadd.f32 %v2146_v18, %v3066_v29  ;;  %v1904_v21 = vpop.f32.mrb[6].mxu1 }
 0x29a   : > { %v1367_v23 = vmax.f32 %v1343_v19, 0.0  ;;  %v2147_v25 = vadd.f32 %v1972_v34, %v1904_v21  ;;  %v992_v27 = vpop.f32.mrb[7].mxu1 }
 0x29b   : > { %v1366_v31 = vmax.f32 %v1342_v20, 0.0  ;;  %v2148_v41 = vadd.f32 %v1218_v37, %v992_v27 }
 0x29c   : > { %1391 = vst [vmem:[%s3070_s16 + $0x28] sm:$0xff] %v1367_v23  ;;  %v1345_v32 = vadd.f32 %v2147_v25, %v3066_v29 }
 0x29d   : > { %1390 = vst [vmem:[%s3070_s16 + $0x20] sm:$0xff] %v1366_v31  ;;  %v1344_v33 = vadd.f32 %v2148_v41, %v3066_v29  ;;  %v1907_v35 = vpop.f32.mrb[8].mxu1 }
 0x29e   : > { %v1369_v36 = vmax.f32 %v1345_v32, 0.0  ;;  %v2149_v50 = vadd.f32 %v1975_v46, %v1907_v35  ;;  %v1002_v39 = vpop.f32.mrb[9].mxu1 }
 0x29f   : > { %v1368_v48 = vmax.f32 %v1344_v33, 0.0  ;;  %v2150_v51 = vadd.f32 %v1228_v56, %v1002_v39 }
 0x2a0   : > { %1393 = vst [vmem:[%s3070_s16 + $0x38] sm:$0xff] %v1369_v36  ;;  %v1347_v53 = vadd.f32 %v2149_v50, %v3066_v29 }
 0x2a1   : > { %1392 = vst [vmem:[%s3070_s16 + $0x30] sm:$0xff] %v1368_v48  ;;  %v1346_v54 = vadd.f32 %v2150_v51, %v3066_v29  ;;  %v1910_v55 = vpop.f32.mrb[10].mxu1 }
 0x2a2   : > { %v1371_v45 = vmax.f32 %v1347_v53, 0.0  ;;  %v2151_v58 = vadd.f32 %v3038_v3, %v1910_v55  ;;  %v1012_v42 = vpop.f32.mrb[11].mxu1 }
 0x2a3   : > { %v1370_v47 = vmax.f32 %v1346_v54, 0.0  ;;  %v2152_v52 = vadd.f32 %v3040_v5, %v1012_v42 }
 0x2a4   : > { %1395 = vst [vmem:[%s3070_s16 + $0x48] sm:$0xff] %v1371_v45  ;;  %v1349_v16 = vadd.f32 %v2151_v58, %v3066_v29 }
 0x2a5   : > { %1394 = vst [vmem:[%s3070_s16 + $0x40] sm:$0xff] %v1370_v47  ;;  %v1348_v22 = vadd.f32 %v2152_v52, %v3066_v29  ;;  %v1913_v28 = vpop.f32.mrb[12].mxu1 }
 0x2a6   : > { %v1373_v34 = vmax.f32 %v1349_v16, 0.0  ;;  %v2153_v37 = vadd.f32 %v3042_v13, %v1913_v28  ;;  %v1022_v46 = vpop.f32.mrb[13].mxu1 }
 0x2a7   : > { %v1372_v56 = vmax.f32 %v1348_v22, 0.0  ;;  %v2154_v3 = vadd.f32 %v3044_v17, %v1022_v46 }
 0x2a8   : > { %1397 = vst [vmem:[%s3070_s16 + $0x58] sm:$0xff] %v1373_v34  ;;  %v1351_v24 = vadd.f32 %v2153_v37, %v3066_v29 }
 0x2a9   : > { %1396 = vst [vmem:[%s3070_s16 + $0x50] sm:$0xff] %v1372_v56  ;;  %v1350_v5 = vadd.f32 %v2154_v3, %v3066_v29  ;;  %v1916_v38 = vpop.f32.mrb[14].mxu1 }
 0x2aa   : > { %v1375_v43 = vmax.f32 %v1351_v24, 0.0  ;;  %v2155_v57 = vadd.f32 %v3046_v26, %v1916_v38  ;;  %v1032_v59 = vpop.f32.mrb[15].mxu1 }
 0x2ab   : > { %v1374_v61 = vmax.f32 %v1350_v5, 0.0  ;;  %v2156_v13 = vadd.f32 %v3048_v30, %v1032_v59 }
 0x2ac   : > { %1399 = vst [vmem:[%s3070_s16 + $0x68] sm:$0xff] %v1375_v43  ;;  %v1353_v62 = vadd.f32 %v2155_v57, %v3066_v29 }
 0x2ad   : > { %1398 = vst [vmem:[%s3070_s16 + $0x60] sm:$0xff] %v1374_v61  ;;  %v1352_v17 = vadd.f32 %v2156_v13, %v3066_v29  ;;  %v1919_v0 = vpop.f32.mrb[16].mxu1 }
 0x2ae   : > { %v1377_v1 = vmax.f32 %v1353_v62, 0.0  ;;  %v2157_v2 = vadd.f32 %v3050_v40, %v1919_v0  ;;  %v1042_v4 = vpop.f32.mrb[17].mxu1 }
 0x2af   : > { %v1376_v6 = vmax.f32 %v1352_v17, 0.0  ;;  %v2158_v26 = vadd.f32 %v3052_v49, %v1042_v4 }
 0x2b0   : > { %1401 = vst [vmem:[%s3070_s16 + $0x78] sm:$0xff] %v1377_v1  ;;  %v1355_v7 = vadd.f32 %v2157_v2, %v3066_v29 }
 0x2b1   : > { %1400 = vst [vmem:[%s3070_s16 + $0x70] sm:$0xff] %v1376_v6  ;;  %v1354_v30 = vadd.f32 %v2158_v26, %v3066_v29  ;;  %v1922_v8 = vpop.f32.mrb[18].mxu1 }
 0x2b2   : > { %v1379_v10 = vmax.f32 %v1355_v7, 0.0  ;;  %v2159_v11 = vadd.f32 %v3054_v60, %v1922_v8  ;;  %v1052_v14 = vpop.f32.mrb[19].mxu1 }
 0x2b3   : > { %v1378_v15 = vmax.f32 %v1354_v30, 0.0  ;;  %v2160_v40 = vadd.f32 %v3056_v63, %v1052_v14 }
 0x2b4   : > { %1403 = vst [vmem:[%s3070_s16 + $0x88] sm:$0xff] %v1379_v10  ;;  %v1357_v49 = vadd.f32 %v2159_v11, %v3066_v29 }
 0x2b5   : > { %1402 = vst [vmem:[%s3070_s16 + $0x80] sm:$0xff] %v1378_v15  ;;  %v1356_v44 = vadd.f32 %v2160_v40, %v3066_v29  ;;  %v1925_v18 = vpop.f32.mrb[20].mxu1 }
 0x2b6   : > { %v1381_v19 = vmax.f32 %v1357_v49, 0.0  ;;  %v2161_v20 = vadd.f32 %v3058_v9, %v1925_v18  ;;  %v1062_v60 = vpop.f32.mrb[21].mxu1 }
 0x2b7   : > { %v1380_v21 = vmax.f32 %v1356_v44, 0.0  ;;  %v2162_v23 = vadd.f32 %v3060_v12, %v1062_v60 }
 0x2b8   : > { %1405 = vst [vmem:[%s3070_s16 + $0x98] sm:$0xff] %v1381_v19  ;;  %v1359_v63 = vadd.f32 %v2161_v20, %v3066_v29 }
 0x2b9   : > { %1404 = vst [vmem:[%s3070_s16 + $0x90] sm:$0xff] %v1380_v21  ;;  %v1358_v25 = vadd.f32 %v2162_v23, %v3066_v29 }
 0x2ba   : > { %v1383_v27 = vmax.f32 %v1359_v63, 0.0 }
 0x2bb   : > { %v1382_v31 = vmax.f32 %v1358_v25, 0.0 }
 0x2bc   : > { %1407 = vst [vmem:[%s3070_s16 + $0xa8] sm:$0xff] %v1383_v27 }
 0x2bd   : > { %1406 = vst [vmem:[%s3070_s16 + $0xa0] sm:$0xff] %v1382_v31 }
 0x2c1   : > { %v1996_v9 = vpop.f32.mrb[22].mxu1 }
 0x2c2   : > { %v1361_v12 = vadd.f32 %v1996_v9, %v3066_v29  ;;  %v1298_v41 = vpop.f32.mrb[23].mxu1 }
 0x2c3   : > { %v1360_v32 = vadd.f32 %v3066_v29, %v1298_v41 }
 0x2c4   : > { %v1385_v33 = vmax.f32 %v1361_v12, 0.0 }
 0x2c5   : > { %v1384_v35 = vmax.f32 %v1360_v32, 0.0 }
 0x2c6   : > { %1409 = vst [vmem:[%s3070_s16 + $0xb8] sm:$0xff] %v1385_v33 }
 0x2c7   : > { %1408 = vst [vmem:[%s3070_s16 + $0xb0] sm:$0xff] %v1384_v35 }
 0x2c8   : > { %2398 = shalt.err (!%p2395_p7)
}
 0x2c9   : > { %s2399_s23 = scalar_lea.hbm %s3134_s22, 3072  ;;  %s2403_s7 = scalar_lea.hbm %s3197_s5, 12288 }
 0x2ca   : > { %p2400_p12 = scmp.ne.s32.totalorder %s3134_s22, %s2399_s23  ;;  %p2404_p5 = scmp.lt.u32.totalorder %s3134_s22, %s3197_s5 }
 0x2cb   : > { %p2405_p9 = scmp.lt.u32.totalorder %s2403_s7, %s2399_s23  ;;  %p2407_p4 = scmp.lt.u32.totalorder %s2399_s23, %s3134_s22 }
 0x2cc   : > { %p2401_p1 = pnand %p2400_p12, %p2675_p8 }
 0x2cd   : > { %p2406_p0 = por %p2405_p9, %p2404_p5 }
 0x2ce   : > { %p2402_p2 = pneg %p2401_p1 }
 0x2cf   : > { %p2408_p10 = por %p2407_p4, %p2406_p0 }
 0x2d1   : > { %p2409_p6 = pnand %p2408_p10, %p2402_p2 }
 0x2d3   : > { %2412 = shalt.err (!%p2409_p6)
}
 0x2d4   : > { %s2495_s16 = smov 128   ;;  %s2496_s11 = smov 8  }
 0x2d5   : > { %2206 = dma.vmem_to_hbm [thread:$0]  (%p2675_p8), %s3136_s27, 3072, %s3134_s22, %s1411_s9, %s2495_s16, %s2495_s16, %s2496_s11  }
 0x2d6 PF: > { %s3233_s10 = sld [smem:[#allocation13_spill]]  ;;  %s3234_s14 = sld [smem:[#allocation15_spill]] }
 0x2d7   : > { %p2228_p11 = scmp.ge.s32.totalorder %s2487_s25, 2 }
 0x2dc   : > { %s1441_s26 = sand.u32 1, %s3233_s10   ;;  %p3235_p13 = scmp.ne.s32.totalorder %s3234_s14, 0 }
 0x2dd   : > { %s1442_s21 = scalar_lea.sflag [#allocation5], %s1441_s26 }
 0x2de   : > { %p2220_p3 = pnand %p2228_p11, %p3235_p13 }
 0x2e0   : > { %2454 = dma.done.wait (!%p2220_p3), %s1442_s21, 3072  }
 0x2e1   : > { %2456 = vsyncadd (!%p2220_p3), %s1442_s21, 4294964224  ;;  %s22_s25 = sadd.s32 1, %s2487_s25   ;;  %s3236_s21 = sld [smem:[#allocation14_spill]] }
 0x2e2   : > { %p19_p7 = scmp.ge.s32.totalorder %s22_s25, 6   ;;  %s3237_s23 = sld [smem:[#allocation16_spill]] }
 0x2e3   : > { %s3238_s12 = sld [smem:[#allocation17_spill]]  ;;  %s3239_s18 = smov %s2463_s19 }
 0x2e4   : > { %s3240_s19 = smov %s2467_s20  ;;  %s3241_s20 = smov %s2694_s1 }
 0x2e5   : > { %s3242_s22 = smov %s2483_s24  ;;  %21 = sbr.rel (!%p19_p7) target bundleno = 11 (0xb), region = 95 }
 0x2e9   : > { %s3243_s24 = smov %s3238_s12 }
 0x2ec   :  { %1447 = vsyncpa [#allocation4], 1 }
 0x2ed   :  { %1449 = vsyncpa [#allocation4 + $0x1], 1 }
 0x2ee   :  { %1450 = vsyncpa [#allocation7], 1 }
 0x2ef   :  { %1451 = vsyncpa [#allocation5], 1 }
 0x2f0   :  { %1453 = vsyncpa [#allocation5 + $0x1], 1 }

// kernel: tpu_custom_call.1
= control target key start
LH: loop header
LB: loop body
LE: loop exit
PB: predicated region body
PF: predicated region fallthrough
CT: control target
= control target key end

     0   :  { %s3192_s0 = inlined_call_operand.hbm [shape: f32[2,2,240,128], index: 0, kind: input, shape index: {}]   ;;  %s3193_s1 = inlined_call_operand.hbm [shape: f32[128,128], index: 1, kind: input, shape index: {}]   ;;  %s3194_s2 = inlined_call_operand.vmem [shape: f32[1,128], index: 2, kind: input, shape index: {}]   ;;  %s3195_s3 = inlined_call_operand.hbm [shape: f32[3,128,128], index: 3, kind: input, shape index: {}]   ;;  %s3196_s4 = inlined_call_operand.vmem [shape: f32[1,128], index: 4, kind: input, shape index: {}]   ;;  %s3197_s5 = inlined_call_operand.hbm [shape: f32[2,2,192,128], index: 5, kind: output, shape index: {}]  }
   0x1   :  { %3209 = sst [smem:[#allocation18_spill]] %s3193_s1 }
   0x2   :  { %3210 = sst [smem:[#allocation19_spill]] %s3195_s3 }
   0x3   :  { %10 = vsyncpa [#allocation4], 0 }
   0x4   :  { %12 = vsyncpa [#allocation4 + $0x1], 0 }
   0x5   :  { %13 = vsyncpa [#allocation7], 0 }
   0x6   :  { %14 = vsyncpa [#allocation5], 0 }
   0x7   :  { %16 = vsyncpa [#allocation5 + $0x1], 0  ;;  %s2527_s18 = smov 0   ;;  %s2529_s19 = smov 0  }
   0x8   :  { %s2531_s20 = smov 0   ;;  %s2533_s21 = smov 0  }
   0x9   :  { %s2535_s22 = smov 0   ;;  %s2537_s23 = smov 0  }
   0xa   :  { %s2539_s24 = smov 0   ;;  %s2541_s25 = smov 0  }
   0xb LB: > { %3211 = sst [smem:[#allocation13_spill]] %s2459_s18  ;;  %s1535_s26 = sadd.s32 4294967295, %s2487_s25   ;;  %s2487_s25 = sphi %s2541_s25, %s22_s25   ;;  %s2483_s24 = sphi %s2539_s24, %s3243_s24   ;;  %s2479_s23 = sphi %s2537_s23, %s3237_s23   ;;  %s2475_s22 = sphi %s2535_s22, %s3242_s22   ;;  %s2471_s21 = sphi %s2533_s21, %s3236_s21   ;;  %s2467_s20 = sphi %s2531_s20, %s3241_s20   ;;  %s2463_s19 = sphi %s2529_s19, %s3240_s19   ;;  %s2459_s18 = sphi %s2527_s18, %s3239_s18  }
   0xc   : > { %3212 = sst [smem:[#allocation14_spill]] %s2479_s23  ;;  %s1536_s27 = sadd.s32 4294967294, %s2487_s25  }
   0xd   : > { %p56_p0 = scmp.ne.s32.totalorder %s2463_s19, %s2459_s18  ;;  %p2571_p1 = scmp.eq.s32.totalorder %s1535_s26, 0 }
   0xe   : > { %p2575_p2 = scmp.eq.s32.totalorder %s1535_s26, 3  ;;  %p172_p3 = scmp.eq.s32.totalorder %s1536_s27, 3 }
   0xf   : > { %s3213_s28 = scalar_select %p2571_p1, 1, 0 }
  0x10   : > { %s3214_s29 = scalar_select %p2575_p2, 1, 0 }
  0x11   : > { %p2581_p4 = por %p2571_p1, %p56_p0  ;;  %p1537_p5 = scmp.ge.s32.totalorder %s2487_s25, 1 }
  0x12   : > { %p2586_p6 = por %p172_p3, %p56_p0  ;;  %p179_p7 = scmp.lt.s32.totalorder %s2487_s25, 5 }
  0x13   : > { %s3215_s30 = scalar_select %p2581_p4, 1, 0 }
  0x14   : > { %s3216_s6 = scalar_select %p2586_p6, 1, 0 }
  0x15   : > { %p2591_p8 = pnand %p1537_p5, %p179_p7  ;;  %s2489_s8 = smov [#allocation6]  }
  0x16   : > { %3217 = sst [smem:[#allocation15_spill]] %s3216_s6  ;;  %s191_s9 = sshll.u32 %s2489_s8, 4  ;;  %s192_s9 = int_to_ptr.vmem [resolvable:$true] %s191_s9 }
  0x17   : > { %s3218_s7 = scalar_select %p2591_p8, 1, 0 }
  0x18   : > { %p2208_p9 = pneg %p2591_p8  ;;  %s2490_s11 = smov [#allocation8]  }
  0x19   : > { %s207_s12 = sshll.u32 %s2490_s11, 4  ;;  %s3220_s1 = sld [smem:[#allocation18_spill]]  ;;  %s2603_s12 = int_to_ptr.vmem [resolvable:$true] %s207_s12 }
  0x1a   : > { %p2599_p10 = pnand %p2208_p9, %p2571_p1 }
  0x1c   : > { %p2301_p12 = pneg %p2599_p10 }
  0x1f   : > { %s2299_s15 = scalar_lea.hbm %s3220_s1, 2048 }
  0x20   : > { %p2300_p11 = scmp.ne.s32.totalorder %s3220_s1, %s2299_s15  ;;  %p2306_p3 = scmp.lt.u32.totalorder %s2299_s15, %s3220_s1 }
  0x22   : > { %p2302_p13 = pnand %p2301_p12, %p2300_p11 }
  0x24   : > { %p2303_p0 = pneg %p2302_p13 }
  0x26   : > { %p2308_p5 = pnand %p2306_p3, %p2303_p0 }
  0x28   : > { %2311 = shalt.err (!%p2308_p5)
}
  0x29   : > { %s2312_s8 = scalar_lea.vmem %s192_s9, 2048  ;;  %p2320_p1 = scmp.lt.s32.totalorder %s192_s9, %s192_s9 }
  0x2a   : > { %p2313_p7 = scmp.ne.s32.totalorder %s192_s9, %s2312_s8  ;;  %p2321_p4 = scmp.lt.s32.totalorder %s2312_s8, %s2312_s8 }
  0x2c   : > { %p2315_p9 = pnand %p2313_p7, %p2301_p12  ;;  %p2322_p8 = por %p2321_p4, %p2320_p1 }
  0x2e   : > { %p2316_p6 = pneg %p2315_p9 }
  0x30   : > { %p2323_p2 = pnand %p2322_p8, %p2316_p6 }
  0x32   : > { %2326 = shalt.err (!%p2323_p2)
}
  0x33   : > { %s3204_s11 = smov 128   ;;  %s3205_s13 = smov 8  }
  0x34   : > { %2211 = dma.hbm_to_vmem [thread:$0]  (!%p2599_p10), %s3220_s1, 2048, %s192_s9, [#allocation7], %s3204_s11, %s3204_s11, %s3205_s13  }
  0x35   : > { %s3221_s3 = sld [smem:[#allocation19_spill]] }
  0x3b   : > { %s2327_s26 = scalar_lea.hbm %s3221_s3, 6144 }
  0x3c   : > { %p2328_p1 = scmp.ne.s32.totalorder %s3221_s3, %s2327_s26  ;;  %p2334_p6 = scmp.lt.u32.totalorder %s2327_s26, %s3221_s3 }
  0x3e   : > { %p2330_p2 = pnand %p2328_p1, %p2301_p12 }
  0x40   : > { %p2331_p4 = pneg %p2330_p2 }
  0x42   : > { %p2336_p8 = pnand %p2334_p6, %p2331_p4 }
  0x44   : > { %2339 = shalt.err (!%p2336_p8)
}
  0x45   : > { %s2340_s9 = scalar_lea.vmem %s2603_s12, 6144  ;;  %p2348_p3 = scmp.lt.s32.totalorder %s2603_s12, %s2603_s12 }
  0x46   : > { %p2341_p11 = scmp.ne.s32.totalorder %s2603_s12, %s2340_s9  ;;  %p2349_p5 = scmp.lt.s32.totalorder %s2340_s9, %s2340_s9 }
  0x48   : > { %p2343_p13 = pnand %p2341_p11, %p2301_p12  ;;  %p2350_p7 = por %p2349_p5, %p2348_p3 }
  0x4a   : > { %p2344_p0 = pneg %p2343_p13 }
  0x4c   : > { %p2351_p9 = pnand %p2350_p7, %p2344_p0 }
  0x4e   : > { %2354 = shalt.err (!%p2351_p9)
}
  0x4f   : > { %2214 = dma.hbm_to_vmem [thread:$0]  (!%p2599_p10), %s3221_s3, 6144, %s2603_s12, [#allocation7], %s3204_s11, %s3204_s11, %s3205_s13  }
  0x50   : > { %s31_s10 = sadd.s32 1, %s2479_s23  ;;  %s34_s14 = sadd.s32 1, %s2483_s24 }
  0x51   : > { %p32_p12 = scmp.ge.s32.totalorder %s31_s10, 2  ;;  %s43_s15 = sadd.s32 1, %s2467_s20 }
  0x52   : > { %p50_p1 = scmp.ne.s32.totalorder %s2467_s20, %s2463_s19  ;;  %p51_p2 = scmp.eq.s32.totalorder %s2487_s25, 0 }
  0x53   : > { %s3245_s10 = smov (%p32_p12, %s31_s10), 0  ;;  %s3247_s14 = smov (!%p32_p12, %s34_s14), %s2483_s24 }
  0x54   : > { %3222 = sst [smem:[#allocation16_spill]] %s3245_s10  ;;  %s39_s16 = ssub.s32 %s2479_s23, %s3245_s10 }
  0x55   : > { %p2669_p4 = por %p51_p2, %p50_p1  ;;  %p36_p10 = scmp.ge.s32.totalorder %s3247_s14, 2 }
  0x56   : > { %p3224_p6 = scmp.ne.s32.totalorder %s3214_s29, 0  ;;  %p2225_p11 = scmp.lt.s32.totalorder %s2487_s25, 4 }
  0x57   : > { %s224_s26 = sand.u32 1, %s2467_s20   ;;  %s3249_s14 = smov (%p36_p10, %s3247_s14), 0 }
  0x58   : > { %p2675_p8 = por %p3224_p6, %p50_p1  ;;  %3226 = sst [smem:[#allocation17_spill]] %s3249_s14 }
  0x59   : > { %s2189_s27 = smul.u32 240, %s224_s26  ;;  %s38_s8 = ssub.s32 %s2483_s24, %s3249_s14 }
  0x5a   : > { %s2190_s9 = smul.u32 30, %s2479_s23  ;;  %s40_s18 = sor.u32 %s39_s16, %s38_s8 }
  0x5b   : > { %p41_p13 = scmp.eq.s32.totalorder %s40_s18, 0  ;;  %s2191_s6 = smul.u32 60, %s2483_s24 }
  0x5c   : > { %s228_s11 = scalar_lea.vmem [#allocation3], %s2189_s27  ;;  %p2689_p0 = pnand %p2225_p11, %p2669_p4 }
  0x5d   : > { %s237_s13 = sshll.u32 %s228_s11, 4  ;;  %s234_s3 = sadd.s32 %s2191_s6, %s2190_s9  ;;  %s2696_s13 = int_to_ptr.vmem [resolvable:$true] %s237_s13 }
  0x5e   : > { %s2694_s1 = scalar_select %p41_p13, %s2467_s20, %s43_s15  }
  0x5f   : > { %s1541_s10 = sshll.u32 %s234_s3, 7  ;;  %s2703_s11 = scalar_lea.sflag [#allocation4], %s224_s26 }
  0x60   : > { %s2701_s16 = scalar_lea.hbm %s3192_s0, %s1541_s10  ;;  %p2357_p5 = pneg %p2689_p0 }
  0x61   : > { %s2355_s17 = scalar_lea.hbm %s2701_s16, 3840  ;;  %s2360_s23 = scalar_lea.hbm %s3192_s0, 15360 }
  0x62   : > { %p2356_p3 = scmp.ne.s32.totalorder %s2701_s16, %s2355_s17  ;;  %p2361_p12 = scmp.lt.u32.totalorder %s2701_s16, %s3192_s0 }
  0x63   : > { %p2362_p1 = scmp.lt.u32.totalorder %s2360_s23, %s2355_s17  ;;  %p2364_p4 = scmp.lt.u32.totalorder %s2355_s17, %s2701_s16 }
  0x64   : > { %p2358_p7 = pnand %p2357_p5, %p2356_p3 }
  0x65   : > { %p2363_p2 = por %p2362_p1, %p2361_p12 }
  0x66   : > { %p2359_p9 = pneg %p2358_p7 }
  0x67   : > { %p2365_p10 = por %p2364_p4, %p2363_p2 }
  0x69   : > { %p2366_p6 = pnand %p2365_p10, %p2359_p9 }
  0x6b   : > { %2369 = shalt.err (!%p2366_p6)
}
  0x6c   : > { %s2370_s26 = scalar_lea.vmem %s2696_s13, 3840  ;;  %s2493_s27 = smov [#allocation3]  }
  0x6d   : > { %p2371_p11 = scmp.ne.s32.totalorder %s2696_s13, %s2370_s26  ;;  %s2375_s8 = sshll.u32 %s2493_s27, 4  ;;  %s2376_s8 = int_to_ptr.vmem [resolvable:$false] %s2375_s8 }
  0x6e   : > { %s2377_s9 = scalar_lea.vmem %s2376_s8, 7680  ;;  %p2378_p7 = scmp.lt.s32.totalorder %s2696_s13, %s2376_s8 }
  0x6f   : > { %p2373_p13 = pnand %p2371_p11, %p2357_p5  ;;  %p2379_p12 = scmp.lt.s32.totalorder %s2377_s9, %s2370_s26 }
  0x71   : > { %p2374_p3 = pneg %p2373_p13  ;;  %p2380_p1 = por %p2379_p12, %p2378_p7 }
  0x73   : > { %p2381_p2 = pnand %p2380_p1, %p2374_p3 }
  0x75   : > { %2384 = shalt.err (!%p2381_p2)
}
  0x76   : > { %s3228_s18 = smov 8   ;;  %s3229_s6 = smov 128  }
  0x77   : > { %2218 = dma.hbm_to_vmem [thread:$0]  (!%p2689_p0), %s2701_s16, 3840, %s2696_s13, %s2703_s11, %s3229_s6, %s3229_s6, %s3228_s18  }
  0x78   : > { %p3230_p5 = scmp.ne.s32.totalorder %s3218_s7, 0 }
  0x79   : > { %s2737_s17 = sand.u32 (!%p3230_p5), 1, %s2463_s19   ;;  %p3231_p9 = scmp.ne.s32.totalorder (!%p3230_p5), %s3215_s30, 0 }
  0x7a   : > { %249 = sbr.rel (%p3230_p5) target bundleno = 726 (0x2d6), region = 40  ;;  %s252_s15 = scalar_lea.sflag (!%p3230_p5), [#allocation4], %s2737_s17 }
  0x7b   : > { %s2192_s3 = smul.u32 (!%p3230_p5), 240, %s2737_s17 }
  0x7d   : > { %s2741_s23 = scalar_lea.vmem (!%p3230_p5), [#allocation3], %s2192_s3 }
  0x81   : > { %2446 = dma.done.wait (%p3231_p9), %s252_s15, 3840  }
  0x82   : > { %2448 = vsyncadd (%p3231_p9), %s252_s15, 4294963456  ;;  %p3232_p0 = scmp.ne.s32.totalorder %s3213_s28, 0 }
  0x84   : > { %2450 = dma.done.wait (%p3232_p0), [#allocation7], 8192  }
  0x85   : > { %2452 = vsyncadd (%p3232_p0), [#allocation7], 4294959104  ;;  %v320_v0 = vld [vmem:[#allocation6] sm:$0xff]  ;;  %v321_v1 = vld [vmem:[#allocation6 + $0x8] sm:$0xff]  ;;  %s2193_s7 = smul.u32 192, %s2737_s17  ;;  %s1411_s9 = scalar_lea.sflag [#allocation5], %s2737_s17 }
  0x86   : > { %v322_v2 = vld [vmem:[#allocation6 + $0x10] sm:$0xff]  ;;  %v1997_v3 = vpack.c.bf16 %v321_v1, %v320_v0  ;;  %v323_v4 = vld [vmem:[#allocation6 + $0x18] sm:$0xff]  ;;  %v324_v6 = vld [vmem:[#allocation6 + $0x20] sm:$0xff]  ;;  %s2194_s11 = smul.u32 24, %s2471_s21  ;;  %s2494_s6 = smov [#allocation9]  }
  0x87   : > { %v2001_v5 = vpack.c.bf16 %v323_v4, %v322_v2  ;;  %v325_v7 = vld [vmem:[#allocation6 + $0x28] sm:$0xff]  ;;  %v290_v9 = vld [vmem:[%s2741_s23] sm:$0xff]  ;;  %v327_v11 = vld [vmem:[#allocation6 + $0x38] sm:$0xff]  ;;  %s3070_s16 = scalar_lea.vmem [#allocation9], %s2193_s7  ;;  %s2195_s10 = smul.u32 48, %s2475_s22 }
  0x88   : > { %1998 = vmatprep.subr.bf16.mxu0 %v1997_v3  ;;  %v2005_v8 = vpack.c.bf16 %v325_v7, %v324_v6  ;;  %v326_v10 = vld [vmem:[#allocation6 + $0x30] sm:$0xff]  ;;  %1748 = vmatprep.mubr.f32.mxu0 %v290_v9  ;;  %v328_v13 = vld [vmem:[#allocation6 + $0x40] sm:$0xff]  ;;  %v329_v14 = vld [vmem:[#allocation6 + $0x48] sm:$0xff]  ;;  %s1426_s27 = sshll.u32 %s3070_s16, 4  ;;  %s2389_s3 = sshll.u32 %s2494_s6, 4  ;;  %s3136_s27 = int_to_ptr.vmem [resolvable:$true] %s1426_s27  ;;  %s2390_s3 = int_to_ptr.vmem [resolvable:$false] %s2389_s3 }
  0x89   : > { %2000 = vmatpush3.bf16.msra.mxu0 %v1997_v3  ;;  %v2009_v12 = vpack.c.bf16 %v327_v11, %v326_v10  ;;  %v2013_v15 = vpack.c.bf16 %v329_v14, %v328_v13  ;;  %v330_v16 = vld [vmem:[#allocation6 + $0x50] sm:$0xff]  ;;  %v331_v17 = vld [vmem:[#allocation6 + $0x58] sm:$0xff]  ;;  %v695_v18 = vld [vmem:[#allocation8 + $0x80] sm:$0xff]  ;;  %s1423_s14 = sadd.s32 %s2195_s10, %s2194_s11  ;;  %s2385_s18 = scalar_lea.vmem %s3136_s27, 3072 }
  0x8a   : > { %2002 = vmatprep.subr.bf16.mxu0 %v2001_v5  ;;  %v696_v19 = vld [vmem:[#allocation8 + $0x88] sm:$0xff]  ;;  %v697_v21 = vld [vmem:[#allocation8 + $0x90] sm:$0xff]  ;;  %v698_v22 = vld [vmem:[#allocation8 + $0x98] sm:$0xff]  ;;  %v2017_v23 = vpack.c.bf16 %v331_v17, %v330_v16  ;;  %s1547_s26 = sshll.u32 %s1423_s14, 7  ;;  %p2386_p4 = scmp.ne.s32.totalorder %s3136_s27, %s2385_s18 }
  0x8b   : > { %v2029_v20 = vpack.c.bf16 %v696_v19, %v695_v18  ;;  %v2033_v24 = vpack.c.bf16 %v698_v22, %v697_v21  ;;  %v699_v25 = vld [vmem:[#allocation8 + $0xa0] sm:$0xff]  ;;  %v700_v26 = vld [vmem:[#allocation8 + $0xa8] sm:$0xff]  ;;  %v701_v31 = vld [vmem:[#allocation8 + $0xb0] sm:$0xff]  ;;  %s3134_s22 = scalar_lea.hbm %s3197_s5, %s1547_s26  ;;  %s2391_s15 = scalar_lea.vmem %s2390_s3, 6144 }
  0x8c   : > { %v332_v27 = vld [vmem:[#allocation6 + $0x60] sm:$0xff]  ;;  %v333_v28 = vld [vmem:[#allocation6 + $0x68] sm:$0xff]  ;;  %v2037_v29 = vpack.c.bf16 %v700_v26, %v699_v25  ;;  %v702_v32 = vld [vmem:[#allocation8 + $0xb8] sm:$0xff]  ;;  %p2387_p10 = pnand %p2386_p4, %p2675_p8  ;;  %p2392_p11 = scmp.lt.s32.totalorder %s3136_s27, %s2390_s3 }
  0x8d   : > { %2004 = vmatpush3.bf16.msra.mxu0 %v2001_v5  ;;  %2030 = vmatprep.subr.bf16.mxu1 %v2029_v20  ;;  %v2021_v30 = vpack.c.bf16 %v333_v28, %v332_v27  ;;  %v334_v33 = vld [vmem:[#allocation6 + $0x70] sm:$0xff]  ;;  %v335_v34 = vld [vmem:[#allocation6 + $0x78] sm:$0xff]  ;;  %v2041_v35 = vpack.c.bf16 %v702_v32, %v701_v31  ;;  %v703_v37 = vld [vmem:[#allocation8 + $0xc0] sm:$0xff]  ;;  %p2393_p13 = scmp.lt.s32.totalorder %s2391_s15, %s2385_s18 }
  0x8e   : > { %2006 = vmatprep.subr.bf16.mxu0 %v2005_v8  ;;  %2032 = vmatpush3.bf16.msra.mxu1 %v2029_v20  ;;  %v2025_v36 = vpack.c.bf16 %v335_v34, %v334_v33  ;;  %v704_v38 = vld [vmem:[#allocation8 + $0xc8] sm:$0xff]  ;;  %v1106_v39 = vld [vmem:[#allocation8 + $0x100] sm:$0xff]  ;;  %v1108_v43 = vld [vmem:[#allocation8 + $0x110] sm:$0xff]  ;;  %p2388_p6 = pneg %p2387_p10 }
  0x8f   : > { %2034 = vmatprep.subr.bf16.mxu1 %v2033_v24  ;;  %v1107_v40 = vld [vmem:[#allocation8 + $0x108] sm:$0xff]  ;;  %v2045_v41 = vpack.c.bf16 %v704_v38, %v703_v37  ;;  %v1109_v44 = vld [vmem:[#allocation8 + $0x118] sm:$0xff]  ;;  %v292_v46 = vld [vmem:[%s2741_s23 + $0x10] sm:$0xff]  ;;  %p2394_p3 = por %p2393_p13, %p2392_p11 }
  0x90   : > { %v2752_v42 = vpack.c.bf16 %v1107_v40, %v1106_v39  ;;  %v291_v45 = vld [vmem:[%s2741_s23 + $0x8] sm:$0xff]  ;;  %v2757_v47 = vpack.c.bf16 %v1109_v44, %v1108_v43  ;;  %v1110_v48 = vld [vmem:[#allocation8 + $0x120] sm:$0xff]  ;;  %v293_v50 = vld [vmem:[%s2741_s23 + $0x18] sm:$0xff]  ;;  %v558_v43 = vlaneseq }
  0x91   : > { %2008 = vmatpush3.bf16.msra.mxu0 %v2005_v8  ;;  %v1111_v49 = vld [vmem:[#allocation8 + $0x128] sm:$0xff]  ;;  %v294_v51 = vld [vmem:[%s2741_s23 + $0x20] sm:$0xff]  ;;  %v296_v54 = vld [vmem:[%s2741_s23 + $0x30] sm:$0xff]  ;;  %p2395_p7 = pnand %p2394_p3, %p2388_p6 }
  0x92   : > { %2010 = vmatprep.subr.bf16.mxu0 %v2009_v12  ;;  %2036 = vmatpush3.bf16.msra.mxu1 %v2033_v24  ;;  %v2763_v52 = vpack.c.bf16 %v1111_v49, %v1110_v48  ;;  %v295_v53 = vld [vmem:[%s2741_s23 + $0x28] sm:$0xff]  ;;  %v297_v55 = vld [vmem:[%s2741_s23 + $0x38] sm:$0xff]  ;;  %v298_v56 = vld [vmem:[%s2741_s23 + $0x40] sm:$0xff] }
  0x93   : > { %2038 = vmatprep.subr.bf16.mxu1 %v2037_v29  ;;  %v299_v57 = vld [vmem:[%s2741_s23 + $0x48] sm:$0xff]  ;;  %v300_v58 = vld [vmem:[%s2741_s23 + $0x50] sm:$0xff]  ;;  %v301_v59 = vld [vmem:[%s2741_s23 + $0x58] sm:$0xff] }
  0x94   : > { %v302_v60 = vld [vmem:[%s2741_s23 + $0x60] sm:$0xff]  ;;  %v303_v61 = vld [vmem:[%s2741_s23 + $0x68] sm:$0xff]  ;;  %v304_v62 = vld [vmem:[%s2741_s23 + $0x70] sm:$0xff] }
  0x95   : > { %2012 = vmatpush3.bf16.msra.mxu0 %v2009_v12  ;;  %v305_v63 = vld [vmem:[%s2741_s23 + $0x78] sm:$0xff]  ;;  %v306_v0 = vld [vmem:[%s2741_s23 + $0x80] sm:$0xff]  ;;  %v307_v1 = vld [vmem:[%s2741_s23 + $0x88] sm:$0xff] }
  0x96   : > { %2014 = vmatprep.subr.bf16.mxu0 %v2013_v15  ;;  %2040 = vmatpush3.bf16.msra.mxu1 %v2037_v29  ;;  %v308_v2 = vld [vmem:[%s2741_s23 + $0x90] sm:$0xff]  ;;  %v309_v3 = vld [vmem:[%s2741_s23 + $0x98] sm:$0xff]  ;;  %v310_v4 = vld [vmem:[%s2741_s23 + $0xa0] sm:$0xff] }
  0x97   : > { %2042 = vmatprep.subr.bf16.mxu1 %v2041_v35  ;;  %v311_v5 = vld [vmem:[%s2741_s23 + $0xa8] sm:$0xff]  ;;  %v312_v6 = vld [vmem:[%s2741_s23 + $0xb0] sm:$0xff]  ;;  %v313_v7 = vld [vmem:[%s2741_s23 + $0xb8] sm:$0xff] }
  0x98   : > { %v314_v8 = vld [vmem:[%s2741_s23 + $0xc0] sm:$0xff]  ;;  %v315_v9 = vld [vmem:[%s2741_s23 + $0xc8] sm:$0xff]  ;;  %v316_v10 = vld [vmem:[%s2741_s23 + $0xd0] sm:$0xff] }
  0x99   : > { %2016 = vmatpush3.bf16.msra.mxu0 %v2013_v15  ;;  %v317_v11 = vld [vmem:[%s2741_s23 + $0xd8] sm:$0xff]  ;;  %v318_v12 = vld [vmem:[%s2741_s23 + $0xe0] sm:$0xff]  ;;  %v319_v13 = vld [vmem:[%s2741_s23 + $0xe8] sm:$0xff] }
  0x9a   : > { %2018 = vmatprep.subr.bf16.mxu0 %v2017_v23  ;;  %2044 = vmatpush3.bf16.msra.mxu1 %v2041_v35  ;;  %v1112_v14 = vld [vmem:[#allocation8 + $0x130] sm:$0xff]  ;;  %v1113_v15 = vld [vmem:[#allocation8 + $0x138] sm:$0xff]  ;;  %v1114_v20 = vld [vmem:[#allocation8 + $0x140] sm:$0xff] }
  0x9b   : > { %2046 = vmatprep.subr.bf16.mxu1 %v2045_v41  ;;  %v2793_v16 = vpack.c.bf16 %v1113_v15, %v1112_v14  ;;  %v705_v17 = vld [vmem:[#allocation8 + $0xd0] sm:$0xff]  ;;  %v706_v18 = vld [vmem:[#allocation8 + $0xd8] sm:$0xff]  ;;  %v1115_v21 = vld [vmem:[#allocation8 + $0x148] sm:$0xff] }
  0x9c   : > { %v2049_v19 = vpack.c.bf16 %v706_v18, %v705_v17  ;;  %v2797_v22 = vpack.c.bf16 %v1115_v21, %v1114_v20  ;;  %v708_v24 = vld [vmem:[#allocation8 + $0xe8] sm:$0xff]  ;;  %v1116_v26 = vld [vmem:[#allocation8 + $0x150] sm:$0xff]  ;;  %v1117_v27 = vld [vmem:[#allocation8 + $0x158] sm:$0xff] }
  0x9d   : > { %2020 = vmatpush3.bf16.msra.mxu0 %v2017_v23  ;;  %v707_v23 = vld [vmem:[#allocation8 + $0xe0] sm:$0xff]  ;;  %v2801_v28 = vpack.c.bf16 %v1117_v27, %v1116_v26  ;;  %v709_v29 = vld [vmem:[#allocation8 + $0xf0] sm:$0xff]  ;;  %v1119_v33 = vld [vmem:[#allocation8 + $0x168] sm:$0xff] }
  0x9e   : > { %2022 = vmatprep.subr.bf16.mxu0 %v2021_v30  ;;  %2048 = vmatpush3.bf16.msra.mxu1 %v2045_v41  ;;  %v2053_v25 = vpack.c.bf16 %v708_v24, %v707_v23  ;;  %v1118_v32 = vld [vmem:[#allocation8 + $0x160] sm:$0xff]  ;;  %v1120_v35 = vld [vmem:[#allocation8 + $0x170] sm:$0xff]  ;;  %v676_v39 = vld [vmem:[#allocation8 + $0x8] sm:$0xff] }
  0x9f   : > { %2050 = vmatprep.subr.bf16.mxu1 %v2049_v19  ;;  %v2805_v34 = vpack.c.bf16 %v1119_v33, %v1118_v32  ;;  %v675_v38 = vld [vmem:[#allocation8] sm:$0xff]  ;;  %v681_v18 = vld [vmem:[#allocation8 + $0x30] sm:$0xff]  ;;  %v684_v32 = vld [vmem:[#allocation8 + $0x48] sm:$0xff] }
  0xa0   : > { %v2061_v40 = vpack.c.bf16 %v676_v39, %v675_v38 }
  0xa1   : > { %2024 = vmatpush3.bf16.msra.mxu0 %v2021_v30  ;;  %v710_v30 = vld [vmem:[#allocation8 + $0xf8] sm:$0xff] }
  0xa2   : > { %2026 = vmatprep.subr.bf16.mxu0 %v2025_v36  ;;  %2052 = vmatpush3.bf16.msra.mxu1 %v2049_v19  ;;  %v2057_v31 = vpack.c.bf16 %v710_v30, %v709_v29  ;;  %v682_v19 = vld [vmem:[#allocation8 + $0x38] sm:$0xff] }
  0xa3   : > { %2054 = vmatprep.subr.bf16.mxu1 %v2053_v25  ;;  %v2073_v27 = vpack.c.bf16 %v682_v19, %v681_v18 }
  0xa5   : > { %2028 = vmatpush3.bf16.msra.mxu0 %v2025_v36  ;;  %v1121_v36 = vld [vmem:[#allocation8 + $0x178] sm:$0xff] }
  0xa6   : > { %2094 = vmatprep.subr.bf16.mxu0 %v2752_v42  ;;  %2056 = vmatpush3.bf16.msra.mxu1 %v2053_v25  ;;  %v2809_v37 = vpack.c.bf16 %v1121_v36, %v1120_v35 }
  0xa7   : > { %2058 = vmatprep.subr.bf16.mxu1 %v2057_v31 }
  0xa8   : > { %1749 = vmatmul.mubr.f32.vlgmr.msra.gmra.mrb[0].mxu0 %v291_v45  ;;  %v2820_v45 = vld [vmem:[%s3194_s2] ss:$0 sm:$0xff] }
  0xa9   : > { %1751 = vmatprep.mubr.f32.mxu0 %v292_v46  ;;  %2096 = vmatpush3.bf16.msra.mxu0 %v2752_v42  ;;  %v2822_v46 = vand.u32 127, %v558_v43 }
  0xaa   : > { %2098 = vmatprep.subr.bf16.mxu0 %v2757_v47  ;;  %2060 = vmatpush3.bf16.msra.mxu1 %v2057_v31  ;;  %v683_v31 = vld [vmem:[#allocation8 + $0x40] sm:$0xff] }
  0xab   : > { %2062 = vmatprep.subr.bf16.mxu1 %v2061_v40  ;;  %vm560_vm0 = vcmp.lt.s32.totalorder %v2822_v46, 24  ;;  %v2077_v43 = vpack.c.bf16 %v684_v32, %v683_v31 }
  0xac   : > { %1752 = vmatmul.mubr.f32.gmra.mrb[2].mxu0 %v293_v50 }
  0xad   : > { %1754 = vmatprep.mubr.f32.mxu0 %v294_v51  ;;  %2100 = vmatpush3.bf16.msra.mxu0 %v2757_v47 }
  0xae   : > { %2102 = vmatprep.subr.bf16.mxu0 %v2763_v52 }
  0xb0   : > { %1755 = vmatmul.mubr.f32.gmra.mrb[4].mxu0 %v295_v53 }
  0xb1   : > { %1757 = vmatprep.mubr.f32.mxu0 %v296_v54  ;;  %2104 = vmatpush3.bf16.msra.mxu0 %v2763_v52 }
  0xb2   : > { %2106 = vmatprep.subr.bf16.mxu0 %v2793_v16 }
  0xb4   : > { %1758 = vmatmul.mubr.f32.gmra.mrb[6].mxu0 %v297_v55 }
  0xb5   : > { %1760 = vmatprep.mubr.f32.mxu0 %v298_v56  ;;  %2108 = vmatpush3.bf16.msra.mxu0 %v2793_v16 }
  0xb6   : > { %2110 = vmatprep.subr.bf16.mxu0 %v2797_v22 }
  0xb8   : > { %1761 = vmatmul.mubr.f32.gmra.mrb[8].mxu0 %v299_v57 }
  0xb9   : > { %1763 = vmatprep.mubr.f32.mxu0 %v300_v58  ;;  %2112 = vmatpush3.bf16.msra.mxu0 %v2797_v22  ;;  %v677_v58 = vld [vmem:[#allocation8 + $0x10] sm:$0xff] }
  0xba   : > { %2114 = vmatprep.subr.bf16.mxu0 %v2801_v28 }
  0xbc   : > { %1764 = vmatmul.mubr.f32.gmra.mrb[10].mxu0 %v301_v59  ;;  %v678_v59 = vld [vmem:[#allocation8 + $0x18] sm:$0xff] }
  0xbd   : > { %1766 = vmatprep.mubr.f32.mxu0 %v302_v60  ;;  %2116 = vmatpush3.bf16.msra.mxu0 %v2801_v28 }
  0xbe   : > { %2118 = vmatprep.subr.bf16.mxu0 %v2805_v34 }
  0xc0   : > { %1767 = vmatmul.mubr.f32.gmra.mrb[12].mxu0 %v303_v61 }
  0xc1   : > { %1769 = vmatprep.mubr.f32.mxu0 %v304_v62  ;;  %2120 = vmatpush3.bf16.msra.mxu0 %v2805_v34 }
  0xc2   : > { %2122 = vmatprep.subr.bf16.mxu0 %v2809_v37 }
  0xc4   : > { %1770 = vmatmul.mubr.f32.gmra.mrb[14].mxu0 %v305_v63 }
  0xc5   : > { %1772 = vmatprep.mubr.f32.mxu0 %v306_v0  ;;  %2124 = vmatpush3.bf16.msra.mxu0 %v2809_v37 }
  0xc8   : > { %1773 = vmatmul.mubr.f32.gmra.mrb[16].mxu0 %v307_v1  ;;  %v2065_v1 = vpack.c.bf16 %v678_v59, %v677_v58 }
  0xc9   : > { %1775 = vmatprep.mubr.f32.mxu0 %v308_v2 }
  0xcc   : > { %1776 = vmatmul.mubr.f32.gmra.mrb[18].mxu0 %v309_v3 }
  0xcd   : > { %1778 = vmatprep.mubr.f32.mxu0 %v310_v4 }
  0xd0   : > { %1779 = vmatmul.mubr.f32.gmra.mrb[20].mxu0 %v311_v5 }
  0xd1   : > { %1781 = vmatprep.mubr.f32.mxu0 %v312_v6  ;;  %v679_v6 = vld [vmem:[#allocation8 + $0x20] sm:$0xff] }
  0xd4   : > { %1782 = vmatmul.mubr.f32.gmra.mrb[22].mxu0 %v313_v7  ;;  %v680_v7 = vld [vmem:[#allocation8 + $0x28] sm:$0xff] }
  0xd5   : > { %1784 = vmatprep.mubr.f32.mxu0 %v314_v8  ;;  %v2069_v14 = vpack.c.bf16 %v680_v7, %v679_v6 }
  0xd8   : > { %1785 = vmatmul.mubr.f32.gmra.mrb[24].mxu0 %v315_v9 }
  0xd9   : > { %1787 = vmatprep.mubr.f32.mxu0 %v316_v10 }
  0xdc   : > { %1788 = vmatmul.mubr.f32.gmra.mrb[26].mxu0 %v317_v11 }
  0xdd   : > { %1790 = vmatprep.mubr.f32.mxu0 %v318_v12 }
  0xe0   : > { %1791 = vmatmul.mubr.f32.gmra.mrb[28].mxu0 %v319_v13 }
 0x17b   : > { %v2813_v41 = vpop.f32.mrb[0].mxu0 }
 0x17c   : > { %v2815_v44 = vpop.f32.mrb[1].mxu0 }
 0x17f   : > { %v1753_v48 = vpop.f32.mrb[2].mxu0 }
 0x180   : > { %v425_v49 = vadd.f32 %v1753_v48, %v2820_v45  ;;  %v2825_v50 = vpop.f32.mrb[3].mxu0 }
 0x182   : > { %v564_v51 = vmax.f32 %v425_v49, 0.0 }
 0x183   : > { %v1756_v53 = vpop.f32.mrb[4].mxu0 }
 0x184   : > { %v435_v54 = vadd.f32 %v1756_v53, %v2820_v45  ;;  %v429_v55 = vpop.f32.mrb[5].mxu0  ;;  %v2831_v56 = vsel %vm560_vm0, %v564_v51, %v425_v49  ;;  %v685_v51 = vld [vmem:[#allocation8 + $0x50] sm:$0xff]  ;;  %v686_v53 = vld [vmem:[#allocation8 + $0x58] sm:$0xff] }
 0x185   : > { %v430_v57 = vadd.f32 %v2820_v45, %v429_v55  ;;  %1825 = vmatprep.mubr.f32.mxu1 %v2831_v56 }
 0x186   : > { %v566_v60 = vmax.f32 %v435_v54, 0.0 }
 0x187   : > { %v565_v61 = vmax.f32 %v430_v57, 0.0  ;;  %v1759_v62 = vpop.f32.mrb[6].mxu0 }
 0x188   : > { %v445_v63 = vadd.f32 %v1759_v62, %v2820_v45  ;;  %v439_v0 = vpop.f32.mrb[7].mxu0  ;;  %v2844_v5 = vsel %vm560_vm0, %v566_v60, %v435_v54 }
 0x189   : > { %v440_v2 = vadd.f32 %v2820_v45, %v439_v0  ;;  %v2839_v3 = vsel %vm560_vm0, %v565_v61, %v430_v57  ;;  %v2081_v61 = vpack.c.bf16 %v686_v53, %v685_v51  ;;  %v687_v0 = vld [vmem:[#allocation8 + $0x60] sm:$0xff] }
 0x18a   : > { %v568_v4 = vmax.f32 %v445_v63, 0.0  ;;  %1826 = vmatmul.mubr.f32.vlgmr.msra.gmra.mrb[0].mxu1 %v2839_v3 }
 0x18b   : > { %v567_v8 = vmax.f32 %v440_v2, 0.0  ;;  %2064 = vmatpush3.bf16.msra.mxu1 %v2061_v40  ;;  %v1762_v9 = vpop.f32.mrb[8].mxu0  ;;  %1828 = vmatprep.mubr.f32.mxu1 %v2844_v5 }
 0x18c   : > { %v455_v10 = vadd.f32 %v1762_v9, %v2820_v45  ;;  %v449_v11 = vpop.f32.mrb[9].mxu0  ;;  %2066 = vmatprep.subr.bf16.mxu1 %v2065_v1  ;;  %v2857_v17 = vsel %vm560_vm0, %v568_v4, %v445_v63 }
 0x18d   : > { %v450_v12 = vadd.f32 %v2820_v45, %v449_v11  ;;  %v2851_v13 = vsel %vm560_vm0, %v567_v8, %v440_v2 }
 0x18e   : > { %v570_v15 = vmax.f32 %v455_v10, 0.0  ;;  %1829 = vmatmul.mubr.f32.gmra.mrb[2].mxu1 %v2851_v13  ;;  %1961 = vmatprep.mubr.f32.mxu0 %v2851_v13 }
 0x18f   : > { %v569_v20 = vmax.f32 %v450_v12, 0.0  ;;  %v1765_v21 = vpop.f32.mrb[10].mxu0  ;;  %1831 = vmatprep.mubr.f32.mxu1 %v2857_v17  ;;  %1962 = vmatmul.mubr.f32.vlgmr.msra.gmra.mrb[30].mxu0 %v2857_v17 }
 0x190   : > { %v465_v23 = vadd.f32 %v1765_v21, %v2820_v45  ;;  %v459_v24 = vpop.f32.mrb[11].mxu0  ;;  %2068 = vmatpush3.bf16.msra.mxu1 %v2065_v1  ;;  %v2871_v30 = vsel %vm560_vm0, %v570_v15, %v455_v10  ;;  %v688_v1 = vld [vmem:[#allocation8 + $0x68] sm:$0xff]  ;;  %v690_v15 = vld [vmem:[#allocation8 + $0x78] sm:$0xff] }
 0x191   : > { %v460_v25 = vadd.f32 %v2820_v45, %v459_v24  ;;  %v2865_v26 = vsel %vm560_vm0, %v569_v20, %v450_v12  ;;  %2070 = vmatprep.subr.bf16.mxu1 %v2069_v14  ;;  %v2085_v10 = vpack.c.bf16 %v688_v1, %v687_v0 }
 0x192   : > { %v572_v29 = vmax.f32 %v465_v23, 0.0  ;;  %1832 = vmatmul.mubr.f32.gmra.mrb[4].mxu1 %v2865_v26  ;;  %1964 = vmatprep.mubr.f32.mxu0 %v2865_v26 }
 0x193   : > { %v571_v33 = vmax.f32 %v460_v25, 0.0  ;;  %v1768_v35 = vpop.f32.mrb[12].mxu0  ;;  %1834 = vmatprep.mubr.f32.mxu1 %v2871_v30  ;;  %1965 = vmatmul.mubr.f32.gmra.mrb[32].mxu0 %v2871_v30 }
 0x194   : > { %v475_v36 = vadd.f32 %v1768_v35, %v2820_v45  ;;  %v469_v38 = vpop.f32.mrb[13].mxu0  ;;  %2072 = vmatpush3.bf16.msra.mxu1 %v2069_v14  ;;  %v2885_v49 = vsel %vm560_vm0, %v572_v29, %v465_v23  ;;  %v689_v14 = vld [vmem:[#allocation8 + $0x70] sm:$0xff] }
 0x195   : > { %v470_v39 = vadd.f32 %v2820_v45, %v469_v38  ;;  %v2879_v40 = vsel %vm560_vm0, %v571_v33, %v460_v25  ;;  %2074 = vmatprep.subr.bf16.mxu1 %v2073_v27  ;;  %v2089_v25 = vpack.c.bf16 %v690_v15, %v689_v14 }
 0x196   : > { %v574_v48 = vmax.f32 %v475_v36, 0.0  ;;  %1835 = vmatmul.mubr.f32.gmra.mrb[6].mxu1 %v2879_v40  ;;  %1967 = vmatprep.mubr.f32.mxu0 %v2879_v40 }
 0x197   : > { %v573_v54 = vmax.f32 %v470_v39, 0.0  ;;  %v1771_v55 = vpop.f32.mrb[14].mxu0  ;;  %1837 = vmatprep.mubr.f32.mxu1 %v2885_v49  ;;  %1968 = vmatmul.mubr.f32.gmra.mrb[34].mxu0 %v2885_v49 }
 0x198   : > { %v485_v57 = vadd.f32 %v1771_v55, %v2820_v45  ;;  %v479_v58 = vpop.f32.mrb[15].mxu0  ;;  %2076 = vmatpush3.bf16.msra.mxu1 %v2073_v27  ;;  %v2899_v63 = vsel %vm560_vm0, %v574_v48, %v475_v36 }
 0x199   : > { %v480_v59 = vadd.f32 %v2820_v45, %v479_v58  ;;  %v2893_v60 = vsel %vm560_vm0, %v573_v54, %v470_v39  ;;  %2078 = vmatprep.subr.bf16.mxu1 %v2077_v43 }
 0x19a   : > { %v576_v62 = vmax.f32 %v485_v57, 0.0  ;;  %1838 = vmatmul.mubr.f32.gmra.mrb[8].mxu1 %v2893_v60  ;;  %1970 = vmatprep.mubr.f32.mxu0 %v2893_v60 }
 0x19b   : > { %v575_v2 = vmax.f32 %v480_v59, 0.0  ;;  %v1774_v4 = vpop.f32.mrb[16].mxu0  ;;  %1840 = vmatprep.mubr.f32.mxu1 %v2899_v63  ;;  %1971 = vmatmul.mubr.f32.gmra.mrb[36].mxu0 %v2899_v63 }
 0x19c   : > { %v495_v6 = vadd.f32 %v1774_v4, %v2820_v45  ;;  %v489_v7 = vpop.f32.mrb[17].mxu0  ;;  %2080 = vmatpush3.bf16.msra.mxu1 %v2077_v43  ;;  %v2913_v12 = vsel %vm560_vm0, %v576_v62, %v485_v57 }
 0x19d   : > { %v490_v8 = vadd.f32 %v2820_v45, %v489_v7  ;;  %v2907_v9 = vsel %vm560_vm0, %v575_v2, %v480_v59  ;;  %2082 = vmatprep.subr.bf16.mxu1 %v2081_v61 }
 0x19e   : > { %v578_v11 = vmax.f32 %v495_v6, 0.0  ;;  %1841 = vmatmul.mubr.f32.gmra.mrb[10].mxu1 %v2907_v9  ;;  %1973 = vmatprep.mubr.f32.mxu0 %v2907_v9 }
 0x19f   : > { %v577_v18 = vmax.f32 %v490_v8, 0.0  ;;  %v1777_v19 = vpop.f32.mrb[18].mxu0  ;;  %1843 = vmatprep.mubr.f32.mxu1 %v2913_v12  ;;  %1974 = vmatmul.mubr.f32.gmra.mrb[38].mxu0 %v2913_v12 }
 0x1a0   : > { %v505_v20 = vadd.f32 %v1777_v19, %v2820_v45  ;;  %v499_v21 = vpop.f32.mrb[19].mxu0  ;;  %2084 = vmatpush3.bf16.msra.mxu1 %v2081_v61  ;;  %v2927_v29 = vsel %vm560_vm0, %v578_v11, %v495_v6  ;;  %v410_v6 = vadd.f32 %v2820_v45, %v2815_v44  ;;  %v415_v44 = vadd.f32 %v2813_v41, %v2820_v45 }
 0x1a1   : > { %v500_v23 = vadd.f32 %v2820_v45, %v499_v21  ;;  %v2921_v24 = vsel %vm560_vm0, %v577_v18, %v490_v8  ;;  %2086 = vmatprep.subr.bf16.mxu1 %v2085_v10  ;;  %v420_v21 = vadd.f32 %v2820_v45, %v2825_v50 }
 0x1a2   : > { %v580_v27 = vmax.f32 %v505_v20, 0.0  ;;  %1844 = vmatmul.mubr.f32.gmra.mrb[12].mxu1 %v2921_v24  ;;  %1976 = vmatprep.mubr.f32.mxu0 %v2921_v24 }
 0x1a3   : > { %v579_v31 = vmax.f32 %v500_v23, 0.0  ;;  %v1780_v32 = vpop.f32.mrb[20].mxu0  ;;  %1846 = vmatprep.mubr.f32.mxu1 %v2927_v29  ;;  %1977 = vmatmul.mubr.f32.gmra.mrb[40].mxu0 %v2927_v29  ;;  %v563_v50 = vmax.f32 %v420_v21, 0.0 }
 0x1a4   : > { %v515_v33 = vadd.f32 %v1780_v32, %v2820_v45  ;;  %v509_v35 = vpop.f32.mrb[21].mxu0  ;;  %2088 = vmatpush3.bf16.msra.mxu1 %v2085_v10  ;;  %v2941_v43 = vsel %vm560_vm0, %v580_v27, %v505_v20  ;;  %v561_v20 = vmax.f32 %v410_v6, 0.0 }
 0x1a5   : > { %v510_v36 = vadd.f32 %v2820_v45, %v509_v35  ;;  %v2935_v38 = vsel %vm560_vm0, %v579_v31, %v500_v23  ;;  %2090 = vmatprep.subr.bf16.mxu1 %v2089_v25 }
 0x1a6   : > { %v582_v39 = vmax.f32 %v515_v33, 0.0  ;;  %1847 = vmatmul.mubr.f32.gmra.mrb[14].mxu1 %v2935_v38  ;;  %1979 = vmatprep.mubr.f32.mxu0 %v2935_v38 }
 0x1a7   : > { %v581_v48 = vmax.f32 %v510_v36, 0.0  ;;  %v1783_v51 = vpop.f32.mrb[22].mxu0  ;;  %1849 = vmatprep.mubr.f32.mxu1 %v2941_v43  ;;  %1980 = vmatmul.mubr.f32.gmra.mrb[42].mxu0 %v2941_v43 }
 0x1a8   : > { %v525_v53 = vadd.f32 %v1783_v51, %v2820_v45  ;;  %v519_v54 = vpop.f32.mrb[23].mxu0  ;;  %2092 = vmatpush3.bf16.msra.mxu1 %v2089_v25  ;;  %v2956_v59 = vsel %vm560_vm0, %v582_v39, %v515_v33  ;;  %v562_v33 = vmax.f32 %v415_v44, 0.0  ;;  %v591_v39 = vsel %vm560_vm0, %v561_v20, %v410_v6 }
 0x1a9   : > { %v520_v55 = vadd.f32 %v2820_v45, %v519_v54  ;;  %v2949_v57 = vsel %vm560_vm0, %v581_v48, %v510_v36  ;;  %2125 = vmatprep.subr.bf16.mxu1 %v2752_v42 }
 0x1aa   : > { %v584_v58 = vmax.f32 %v525_v53, 0.0  ;;  %1850 = vmatmul.mubr.f32.gmra.mrb[16].mxu1 %v2949_v57  ;;  %1982 = vmatprep.mubr.f32.mxu0 %v2949_v57 }
 0x1ab   : > { %v583_v61 = vmax.f32 %v520_v55, 0.0  ;;  %v1786_v62 = vpop.f32.mrb[24].mxu0  ;;  %1852 = vmatprep.mubr.f32.mxu1 %v2956_v59  ;;  %1983 = vmatmul.mubr.f32.gmra.mrb[44].mxu0 %v2956_v59 }
 0x1ac   : > { %v535_v0 = vadd.f32 %v1786_v62, %v2820_v45  ;;  %v529_v1 = vpop.f32.mrb[25].mxu0  ;;  %v2972_v8 = vsel %vm560_vm0, %v584_v58, %v525_v53  ;;  %v593_v58 = vsel %vm560_vm0, %v563_v50, %v420_v21 }
 0x1ad   : > { %v530_v2 = vadd.f32 %v2820_v45, %v529_v1  ;;  %v2964_v4 = vsel %vm560_vm0, %v583_v61, %v520_v55  ;;  %v592_v55 = vsel %vm560_vm0, %v562_v33, %v415_v44 }
 0x1ae   : > { %v586_v7 = vmax.f32 %v535_v0, 0.0  ;;  %1853 = vmatmul.mubr.f32.gmra.mrb[18].mxu1 %v2964_v4  ;;  %1985 = vmatprep.mubr.f32.mxu0 %v2964_v4 }
 0x1af   : > { %v585_v10 = vmax.f32 %v530_v2, 0.0  ;;  %v1789_v11 = vpop.f32.mrb[26].mxu0  ;;  %1855 = vmatprep.mubr.f32.mxu1 %v2972_v8  ;;  %1986 = vmatmul.mubr.f32.gmra.mrb[46].mxu0 %v2972_v8 }
 0x1b0   : > { %v545_v14 = vadd.f32 %v1789_v11, %v2820_v45  ;;  %v539_v15 = vpop.f32.mrb[27].mxu0  ;;  %v616_v25 = vsel %vm560_vm0, %v586_v7, %v535_v0 }
 0x1b1   : > { %v540_v18 = vadd.f32 %v2820_v45, %v539_v15  ;;  %v615_v19 = vsel %vm560_vm0, %v585_v10, %v530_v2 }
 0x1b2   : > { %v588_v23 = vmax.f32 %v545_v14, 0.0  ;;  %1856 = vmatmul.mubr.f32.gmra.mrb[20].mxu1 %v615_v19  ;;  %1988 = vmatprep.mubr.f32.mxu0 %v615_v19 }
 0x1b3   : > { %v587_v27 = vmax.f32 %v540_v18, 0.0  ;;  %1858 = vmatprep.mubr.f32.mxu1 %v616_v25  ;;  %1989 = vmatmul.mubr.f32.gmra.mrb[48].mxu0 %v616_v25  ;;  %v1792_v31 = vpop.f32.mrb[28].mxu0 }
 0x1b4   : > { %v555_v41 = vadd.f32 %v1792_v31, %v2820_v45  ;;  %v549_v32 = vpop.f32.mrb[29].mxu0  ;;  %v618_v48 = vsel %vm560_vm0, %v588_v23, %v545_v14 }
 0x1b5   : > { %v617_v35 = vsel %vm560_vm0, %v587_v27, %v540_v18  ;;  %v550_v36 = vadd.f32 %v2820_v45, %v549_v32 }
 0x1b6   : > { %1859 = vmatmul.mubr.f32.gmra.mrb[22].mxu1 %v617_v35  ;;  %1991 = vmatprep.mubr.f32.mxu0 %v617_v35  ;;  %v590_v51 = vmax.f32 %v555_v41, 0.0 }
 0x1b7   : > { %1893 = vmatprep.mubr.f32.mxu1 %v591_v39  ;;  %1992 = vmatmul.mubr.f32.gmra.mrb[50].mxu0 %v618_v48  ;;  %v589_v53 = vmax.f32 %v550_v36, 0.0 }
 0x1b8   : > { %v620_v54 = vsel %vm560_vm0, %v590_v51, %v555_v41 }
 0x1b9   : > { %v619_v45 = vsel %vm560_vm0, %v589_v53, %v550_v36 }
 0x1ba   : > { %1894 = vmatmul.mubr.f32.vlgmr.msra.gmra.mrb[0].mxu1 %v592_v55 }
 0x1bb   : > { %2133 = vmatpush3.bf16.msra.mxu1 %v2752_v42  ;;  %1896 = vmatprep.mubr.f32.mxu1 %v593_v58 }
 0x1bc   : > { %2126 = vmatprep.subr.bf16.mxu1 %v2757_v47 }
 0x1be   : > { %1897 = vmatmul.mubr.f32.gmra.mrb[2].mxu1 %v2831_v56 }
 0x1bf   : > { %1899 = vmatprep.mubr.f32.mxu1 %v2839_v3  ;;  %2134 = vmatpush3.bf16.msra.mxu1 %v2757_v47 }
 0x1c0   : > { %2127 = vmatprep.subr.bf16.mxu1 %v2763_v52 }
 0x1c2   : > { %1900 = vmatmul.mubr.f32.gmra.mrb[4].mxu1 %v2844_v5 }
 0x1c3   : > { %1902 = vmatprep.mubr.f32.mxu1 %v2851_v13  ;;  %2135 = vmatpush3.bf16.msra.mxu1 %v2763_v52 }
 0x1c4   : > { %2128 = vmatprep.subr.bf16.mxu1 %v2793_v16 }
 0x1c6   : > { %1903 = vmatmul.mubr.f32.gmra.mrb[6].mxu1 %v2857_v17 }
 0x1c7   : > { %1905 = vmatprep.mubr.f32.mxu1 %v2865_v26  ;;  %2136 = vmatpush3.bf16.msra.mxu1 %v2793_v16 }
 0x1c8   : > { %2129 = vmatprep.subr.bf16.mxu1 %v2797_v22 }
 0x1ca   : > { %1906 = vmatmul.mubr.f32.gmra.mrb[8].mxu1 %v2871_v30 }
 0x1cb   : > { %1908 = vmatprep.mubr.f32.mxu1 %v2879_v40  ;;  %2137 = vmatpush3.bf16.msra.mxu1 %v2797_v22 }
 0x1cc   : > { %2130 = vmatprep.subr.bf16.mxu1 %v2801_v28 }
 0x1ce   : > { %1909 = vmatmul.mubr.f32.gmra.mrb[10].mxu1 %v2885_v49 }
 0x1cf   : > { %1911 = vmatprep.mubr.f32.mxu1 %v2893_v60  ;;  %2138 = vmatpush3.bf16.msra.mxu1 %v2801_v28 }
 0x1d0   : > { %2131 = vmatprep.subr.bf16.mxu1 %v2805_v34 }
 0x1d2   : > { %1912 = vmatmul.mubr.f32.gmra.mrb[12].mxu1 %v2899_v63 }
 0x1d3   : > { %1914 = vmatprep.mubr.f32.mxu1 %v2907_v9  ;;  %2139 = vmatpush3.bf16.msra.mxu1 %v2805_v34 }
 0x1d4   : > { %2132 = vmatprep.subr.bf16.mxu1 %v2809_v37 }
 0x1d6   : > { %1915 = vmatmul.mubr.f32.gmra.mrb[14].mxu1 %v2913_v12 }
 0x1d7   : > { %1917 = vmatprep.mubr.f32.mxu1 %v2921_v24  ;;  %2140 = vmatpush3.bf16.msra.mxu1 %v2809_v37 }
 0x1da   : > { %1918 = vmatmul.mubr.f32.gmra.mrb[16].mxu1 %v2927_v29  ;;  %v3066_v29 = vld [vmem:[%s3196_s4] ss:$0 sm:$0xff] }
 0x1db   : > { %1920 = vmatprep.mubr.f32.mxu1 %v2935_v38 }
 0x1de   : > { %1921 = vmatmul.mubr.f32.gmra.mrb[18].mxu1 %v2941_v43 }
 0x1df   : > { %1923 = vmatprep.mubr.f32.mxu1 %v2949_v57 }
 0x1e2   : > { %1924 = vmatmul.mubr.f32.gmra.mrb[20].mxu1 %v2956_v59 }
 0x1e3   : > { %1926 = vmatprep.mubr.f32.mxu1 %v2964_v4 }
 0x1e6   : > { %1927 = vmatmul.mubr.f32.gmra.mrb[22].mxu1 %v2972_v8 }
 0x1e7   : > { %1994 = vmatprep.mubr.f32.mxu1 %v619_v45 }
 0x1ee   : > { %1995 = vmatmul.mubr.f32.vlgmr.msra.gmra.mrb[22].mxu1 %v620_v54 }
 0x262   : > { %v1963_v42 = vpop.f32.mrb[30].mxu0 }
 0x263   : > { %v1188_v47 = vpop.f32.mrb[31].mxu0 }
 0x266   : > { %v1966_v52 = vpop.f32.mrb[32].mxu0 }
 0x267   : > { %v1198_v16 = vpop.f32.mrb[33].mxu0 }
 0x26a   : > { %v1969_v22 = vpop.f32.mrb[34].mxu0 }
 0x26b   : > { %v1208_v28 = vpop.f32.mrb[35].mxu0 }
 0x26e   : > { %v1972_v34 = vpop.f32.mrb[36].mxu0 }
 0x26f   : > { %v1218_v37 = vpop.f32.mrb[37].mxu0 }
 0x272   : > { %v1975_v46 = vpop.f32.mrb[38].mxu0 }
 0x273   : > { %v1228_v56 = vpop.f32.mrb[39].mxu0 }
 0x276   : > { %v3038_v3 = vpop.f32.mrb[40].mxu0 }
 0x277   : > { %v3040_v5 = vpop.f32.mrb[41].mxu0 }
 0x27a   : > { %v3042_v13 = vpop.f32.mrb[42].mxu0 }
 0x27b   : > { %v3044_v17 = vpop.f32.mrb[43].mxu0 }
 0x27e   : > { %v3046_v26 = vpop.f32.mrb[44].mxu0 }
 0x27f   : > { %v3048_v30 = vpop.f32.mrb[45].mxu0 }
 0x282   : > { %v3050_v40 = vpop.f32.mrb[46].mxu0 }
 0x283   : > { %v3052_v49 = vpop.f32.mrb[47].mxu0 }
 0x286   : > { %v3054_v60 = vpop.f32.mrb[48].mxu0 }
 0x287   : > { %v3056_v63 = vpop.f32.mrb[49].mxu0 }
 0x28a   : > { %v3058_v9 = vpop.f32.mrb[50].mxu0 }
 0x28b   : > { %v3060_v12 = vpop.f32.mrb[51].mxu0 }
 0x28d   : > { %v1895_v24 = vpop.f32.mrb[0].mxu1 }
 0x28e   : > { %v2141_v38 = vadd.f32 %v1963_v42, %v1895_v24  ;;  %v962_v43 = vpop.f32.mrb[1].mxu1 }
 0x28f   : > { %v2142_v57 = vadd.f32 %v1188_v47, %v962_v43 }
 0x290   : > { %v1339_v59 = vadd.f32 %v2141_v38, %v3066_v29 }
 0x291   : > { %v1338_v61 = vadd.f32 %v2142_v57, %v3066_v29  ;;  %v1898_v62 = vpop.f32.mrb[2].mxu1 }
 0x292   : > { %v1363_v0 = vmax.f32 %v1339_v59, 0.0  ;;  %v2143_v1 = vadd.f32 %v1966_v52, %v1898_v62  ;;  %v972_v2 = vpop.f32.mrb[3].mxu1 }
 0x293   : > { %v1362_v4 = vmax.f32 %v1338_v61, 0.0  ;;  %v2144_v6 = vadd.f32 %v1198_v16, %v972_v2 }
 0x294   : > { %1387 = vst [vmem:[%s3070_s16 + $0x8] sm:$0xff] %v1363_v0  ;;  %v1341_v7 = vadd.f32 %v2143_v1, %v3066_v29 }
 0x295   : > { %1386 = vst [vmem:[%s3070_s16] sm:$0xff] %v1362_v4  ;;  %v1340_v8 = vadd.f32 %v2144_v6, %v3066_v29  ;;  %v1901_v10 = vpop.f32.mrb[4].mxu1 }
 0x296   : > { %v1365_v11 = vmax.f32 %v1341_v7, 0.0  ;;  %v2145_v14 = vadd.f32 %v1969_v22, %v1901_v10  ;;  %v982_v15 = vpop.f32.mrb[5].mxu1 }
 0x297   : > { %v1364_v44 = vmax.f32 %v1340_v8, 0.0  ;;  %v2146_v18 = vadd.f32 %v1208_v28, %v982_v15 }
 0x298   : > { %1389 = vst [vmem:[%s3070_s16 + $0x18] sm:$0xff] %v1365_v11  ;;  %v1343_v19 = vadd.f32 %v2145_v14, %v3066_v29 }
 0x299   : > { %1388 = vst [vmem:[%s3070_s16 + $0x10] sm:$0xff] %v1364_v44  ;;  %v1342_v20 = vadd.f32 %v2146_v18, %v3066_v29  ;;  %v1904_v21 = vpop.f32.mrb[6].mxu1 }
 0x29a   : > { %v1367_v23 = vmax.f32 %v1343_v19, 0.0  ;;  %v2147_v25 = vadd.f32 %v1972_v34, %v1904_v21  ;;  %v992_v27 = vpop.f32.mrb[7].mxu1 }
 0x29b   : > { %v1366_v31 = vmax.f32 %v1342_v20, 0.0  ;;  %v2148_v41 = vadd.f32 %v1218_v37, %v992_v27 }
 0x29c   : > { %1391 = vst [vmem:[%s3070_s16 + $0x28] sm:$0xff] %v1367_v23  ;;  %v1345_v32 = vadd.f32 %v2147_v25, %v3066_v29 }
 0x29d   : > { %1390 = vst [vmem:[%s3070_s16 + $0x20] sm:$0xff] %v1366_v31  ;;  %v1344_v33 = vadd.f32 %v2148_v41, %v3066_v29  ;;  %v1907_v35 = vpop.f32.mrb[8].mxu1 }
 0x29e   : > { %v1369_v36 = vmax.f32 %v1345_v32, 0.0  ;;  %v2149_v50 = vadd.f32 %v1975_v46, %v1907_v35  ;;  %v1002_v39 = vpop.f32.mrb[9].mxu1 }
 0x29f   : > { %v1368_v48 = vmax.f32 %v1344_v33, 0.0  ;;  %v2150_v51 = vadd.f32 %v1228_v56, %v1002_v39 }
 0x2a0   : > { %1393 = vst [vmem:[%s3070_s16 + $0x38] sm:$0xff] %v1369_v36  ;;  %v1347_v53 = vadd.f32 %v2149_v50, %v3066_v29 }
 0x2a1   : > { %1392 = vst [vmem:[%s3070_s16 + $0x30] sm:$0xff] %v1368_v48  ;;  %v1346_v54 = vadd.f32 %v2150_v51, %v3066_v29  ;;  %v1910_v55 = vpop.f32.mrb[10].mxu1 }
 0x2a2   : > { %v1371_v45 = vmax.f32 %v1347_v53, 0.0  ;;  %v2151_v58 = vadd.f32 %v3038_v3, %v1910_v55  ;;  %v1012_v42 = vpop.f32.mrb[11].mxu1 }
 0x2a3   : > { %v1370_v47 = vmax.f32 %v1346_v54, 0.0  ;;  %v2152_v52 = vadd.f32 %v3040_v5, %v1012_v42 }
 0x2a4   : > { %1395 = vst [vmem:[%s3070_s16 + $0x48] sm:$0xff] %v1371_v45  ;;  %v1349_v16 = vadd.f32 %v2151_v58, %v3066_v29 }
 0x2a5   : > { %1394 = vst [vmem:[%s3070_s16 + $0x40] sm:$0xff] %v1370_v47  ;;  %v1348_v22 = vadd.f32 %v2152_v52, %v3066_v29  ;;  %v1913_v28 = vpop.f32.mrb[12].mxu1 }
 0x2a6   : > { %v1373_v34 = vmax.f32 %v1349_v16, 0.0  ;;  %v2153_v37 = vadd.f32 %v3042_v13, %v1913_v28  ;;  %v1022_v46 = vpop.f32.mrb[13].mxu1 }
 0x2a7   : > { %v1372_v56 = vmax.f32 %v1348_v22, 0.0  ;;  %v2154_v3 = vadd.f32 %v3044_v17, %v1022_v46 }
 0x2a8   : > { %1397 = vst [vmem:[%s3070_s16 + $0x58] sm:$0xff] %v1373_v34  ;;  %v1351_v24 = vadd.f32 %v2153_v37, %v3066_v29 }
 0x2a9   : > { %1396 = vst [vmem:[%s3070_s16 + $0x50] sm:$0xff] %v1372_v56  ;;  %v1350_v5 = vadd.f32 %v2154_v3, %v3066_v29  ;;  %v1916_v38 = vpop.f32.mrb[14].mxu1 }
 0x2aa   : > { %v1375_v43 = vmax.f32 %v1351_v24, 0.0  ;;  %v2155_v57 = vadd.f32 %v3046_v26, %v1916_v38  ;;  %v1032_v59 = vpop.f32.mrb[15].mxu1 }
 0x2ab   : > { %v1374_v61 = vmax.f32 %v1350_v5, 0.0  ;;  %v2156_v13 = vadd.f32 %v3048_v30, %v1032_v59 }
 0x2ac   : > { %1399 = vst [vmem:[%s3070_s16 + $0x68] sm:$0xff] %v1375_v43  ;;  %v1353_v62 = vadd.f32 %v2155_v57, %v3066_v29 }
 0x2ad   : > { %1398 = vst [vmem:[%s3070_s16 + $0x60] sm:$0xff] %v1374_v61  ;;  %v1352_v17 = vadd.f32 %v2156_v13, %v3066_v29  ;;  %v1919_v0 = vpop.f32.mrb[16].mxu1 }
 0x2ae   : > { %v1377_v1 = vmax.f32 %v1353_v62, 0.0  ;;  %v2157_v2 = vadd.f32 %v3050_v40, %v1919_v0  ;;  %v1042_v4 = vpop.f32.mrb[17].mxu1 }
 0x2af   : > { %v1376_v6 = vmax.f32 %v1352_v17, 0.0  ;;  %v2158_v26 = vadd.f32 %v3052_v49, %v1042_v4 }
 0x2b0   : > { %1401 = vst [vmem:[%s3070_s16 + $0x78] sm:$0xff] %v1377_v1  ;;  %v1355_v7 = vadd.f32 %v2157_v2, %v3066_v29 }
 0x2b1   : > { %1400 = vst [vmem:[%s3070_s16 + $0x70] sm:$0xff] %v1376_v6  ;;  %v1354_v30 = vadd.f32 %v2158_v26, %v3066_v29  ;;  %v1922_v8 = vpop.f32.mrb[18].mxu1 }
 0x2b2   : > { %v1379_v10 = vmax.f32 %v1355_v7, 0.0  ;;  %v2159_v11 = vadd.f32 %v3054_v60, %v1922_v8  ;;  %v1052_v14 = vpop.f32.mrb[19].mxu1 }
 0x2b3   : > { %v1378_v15 = vmax.f32 %v1354_v30, 0.0  ;;  %v2160_v40 = vadd.f32 %v3056_v63, %v1052_v14 }
 0x2b4   : > { %1403 = vst [vmem:[%s3070_s16 + $0x88] sm:$0xff] %v1379_v10  ;;  %v1357_v49 = vadd.f32 %v2159_v11, %v3066_v29 }
 0x2b5   : > { %1402 = vst [vmem:[%s3070_s16 + $0x80] sm:$0xff] %v1378_v15  ;;  %v1356_v44 = vadd.f32 %v2160_v40, %v3066_v29  ;;  %v1925_v18 = vpop.f32.mrb[20].mxu1 }
 0x2b6   : > { %v1381_v19 = vmax.f32 %v1357_v49, 0.0  ;;  %v2161_v20 = vadd.f32 %v3058_v9, %v1925_v18  ;;  %v1062_v60 = vpop.f32.mrb[21].mxu1 }
 0x2b7   : > { %v1380_v21 = vmax.f32 %v1356_v44, 0.0  ;;  %v2162_v23 = vadd.f32 %v3060_v12, %v1062_v60 }
 0x2b8   : > { %1405 = vst [vmem:[%s3070_s16 + $0x98] sm:$0xff] %v1381_v19  ;;  %v1359_v63 = vadd.f32 %v2161_v20, %v3066_v29 }
 0x2b9   : > { %1404 = vst [vmem:[%s3070_s16 + $0x90] sm:$0xff] %v1380_v21  ;;  %v1358_v25 = vadd.f32 %v2162_v23, %v3066_v29 }
 0x2ba   : > { %v1383_v27 = vmax.f32 %v1359_v63, 0.0 }
 0x2bb   : > { %v1382_v31 = vmax.f32 %v1358_v25, 0.0 }
 0x2bc   : > { %1407 = vst [vmem:[%s3070_s16 + $0xa8] sm:$0xff] %v1383_v27 }
 0x2bd   : > { %1406 = vst [vmem:[%s3070_s16 + $0xa0] sm:$0xff] %v1382_v31 }
 0x2c1   : > { %v1996_v9 = vpop.f32.mrb[22].mxu1 }
 0x2c2   : > { %v1361_v12 = vadd.f32 %v1996_v9, %v3066_v29  ;;  %v1298_v41 = vpop.f32.mrb[23].mxu1 }
 0x2c3   : > { %v1360_v32 = vadd.f32 %v3066_v29, %v1298_v41 }
 0x2c4   : > { %v1385_v33 = vmax.f32 %v1361_v12, 0.0 }
 0x2c5   : > { %v1384_v35 = vmax.f32 %v1360_v32, 0.0 }
 0x2c6   : > { %1409 = vst [vmem:[%s3070_s16 + $0xb8] sm:$0xff] %v1385_v33 }
 0x2c7   : > { %1408 = vst [vmem:[%s3070_s16 + $0xb0] sm:$0xff] %v1384_v35 }
 0x2c8   : > { %2398 = shalt.err (!%p2395_p7)
}
 0x2c9   : > { %s2399_s23 = scalar_lea.hbm %s3134_s22, 3072  ;;  %s2403_s7 = scalar_lea.hbm %s3197_s5, 12288 }
 0x2ca   : > { %p2400_p12 = scmp.ne.s32.totalorder %s3134_s22, %s2399_s23  ;;  %p2404_p5 = scmp.lt.u32.totalorder %s3134_s22, %s3197_s5 }
 0x2cb   : > { %p2405_p9 = scmp.lt.u32.totalorder %s2403_s7, %s2399_s23  ;;  %p2407_p4 = scmp.lt.u32.totalorder %s2399_s23, %s3134_s22 }
 0x2cc   : > { %p2401_p1 = pnand %p2400_p12, %p2675_p8 }
 0x2cd   : > { %p2406_p0 = por %p2405_p9, %p2404_p5 }
 0x2ce   : > { %p2402_p2 = pneg %p2401_p1 }
 0x2cf   : > { %p2408_p10 = por %p2407_p4, %p2406_p0 }
 0x2d1   : > { %p2409_p6 = pnand %p2408_p10, %p2402_p2 }
 0x2d3   : > { %2412 = shalt.err (!%p2409_p6)
}
 0x2d4   : > { %s2495_s16 = smov 128   ;;  %s2496_s11 = smov 8  }
 0x2d5   : > { %2206 = dma.vmem_to_hbm [thread:$0]  (%p2675_p8), %s3136_s27, 3072, %s3134_s22, %s1411_s9, %s2495_s16, %s2495_s16, %s2496_s11  }
 0x2d6 PF: > { %s3233_s10 = sld [smem:[#allocation13_spill]]  ;;  %s3234_s14 = sld [smem:[#allocation15_spill]] }
 0x2d7   : > { %p2228_p11 = scmp.ge.s32.totalorder %s2487_s25, 2 }
 0x2dc   : > { %s1441_s26 = sand.u32 1, %s3233_s10   ;;  %p3235_p13 = scmp.ne.s32.totalorder %s3234_s14, 0 }
 0x2dd   : > { %s1442_s21 = scalar_lea.sflag [#allocation5], %s1441_s26 }
 0x2de   : > { %p2220_p3 = pnand %p2228_p11, %p3235_p13 }
 0x2e0   : > { %2454 = dma.done.wait (!%p2220_p3), %s1442_s21, 3072  }
 0x2e1   : > { %2456 = vsyncadd (!%p2220_p3), %s1442_s21, 4294964224  ;;  %s22_s25 = sadd.s32 1, %s2487_s25   ;;  %s3236_s21 = sld [smem:[#allocation14_spill]] }
 0x2e2   : > { %p19_p7 = scmp.ge.s32.totalorder %s22_s25, 6   ;;  %s3237_s23 = sld [smem:[#allocation16_spill]] }
 0x2e3   : > { %s3238_s12 = sld [smem:[#allocation17_spill]]  ;;  %s3239_s18 = smov %s2463_s19 }
 0x2e4   : > { %s3240_s19 = smov %s2467_s20  ;;  %s3241_s20 = smov %s2694_s1 }
 0x2e5   : > { %s3242_s22 = smov %s2483_s24  ;;  %21 = sbr.rel (!%p19_p7) target bundleno = 11 (0xb), region = 95 }
 0x2e9   : > { %s3243_s24 = smov %s3238_s12 }
 0x2ec   :  { %1447 = vsyncpa [#allocation4], 1 }
 0x2ed   :  { %1449 = vsyncpa [#allocation4 + $0x1], 1 }
 0x2ee   :  { %1450 = vsyncpa [#allocation7], 1 }
 0x2ef   :  { %1451 = vsyncpa [#allocation5], 1 }
 0x2f0   :  { %1453 = vsyncpa [#allocation5 + $0x1], 1 }

</bundles_post_ra>
